<compile_context>
chip_gen: v6e
topology: v6e:2x2x1
jax: 0.10.0
libtpu: 0.0.40
codegen_flags: <defaults>
</compile_context>

<pallas_src>
import math
from math import comb

import numpy as np
import jax
import jax.numpy as jnp
from jax import lax
from jax.experimental import pallas as pl
from jax.experimental.pallas import tpu as pltpu


def _bezier_matrix(s: np.ndarray, n: int) -> np.ndarray:
    """Bernstein basis matrix, shape (len(s), n+1), float64."""
    P = s.shape[0]
    M = np.zeros((P, n + 1), dtype=np.float64)
    for j in range(n + 1):
        M[:, j] = comb(n, j) * (s ** j) * ((1.0 - s) ** (n - j))
    return M


def make_fused_basis(bezier_order: int, num_points: int, deltaT: float) -> jnp.ndarray:
    """(K, 3P) constant: cxy @ M_fused = [positions | velocities | accelerations]."""
    n = bezier_order
    K = n + 1
    s = np.linspace(0.0, 1.0, num_points)
    M = _bezier_matrix(s, n)          # (P, K)
    Md = _bezier_matrix(s, n - 1)     # (P, K-1)
    Md2 = _bezier_matrix(s, n - 2)    # (P, K-2)

    # First / second finite-difference operators acting on control points (right-mul).
    D1 = np.zeros((K, K - 1), dtype=np.float64)
    for i in range(K - 1):
        D1[i, i] = -1.0
        D1[i + 1, i] = 1.0
    D2 = np.zeros((K - 1, K - 2), dtype=np.float64)
    for i in range(K - 2):
        D2[i, i] = -1.0
        D2[i + 1, i] = 1.0

    MT_pos = M.T                                                       # (K, P)
    MT_vel = (n / deltaT) * (D1 @ Md.T)                                # (K, P)
    MT_acc = (n * (n - 1.0) / (deltaT * deltaT)) * (D1 @ D2 @ Md2.T)   # (K, P)
    fused = np.concatenate([MT_pos, MT_vel, MT_acc], axis=1)           # (K, 3P)
    return jnp.asarray(fused, dtype=jnp.float32)


def _make_kernel(*, num_samples, num_points, beta_speed, beta_ca, beta_brake,
                 beta_boundary, boundary_allowance, max_ca, brake_xs, brake_ys):
    N, P = num_samples, num_points
    LOG_MIN_BOUNDARY = math.log(1e-32)   # lower clip of boundary_scores, in log space

    def braking_limit(sp):
        # Piecewise-linear interpolation of braking limit vs speed, with linear
        # extrapolation using the end segments (clamped-index searchsorted semantics).
        out = jnp.full_like(sp, brake_ys[0])
        S = len(brake_xs)
        for i in range(S - 1):
            x0, x1 = brake_xs[i], brake_xs[i + 1]
            y0, y1 = brake_ys[i], brake_ys[i + 1]
            slope = (y1 - y0) / (x1 - x0)
            seg = sp - x0
            if i == 0:
                seg = jnp.minimum(seg, x1 - x0)          # extrapolate below x0
            elif i == S - 2:
                seg = jnp.maximum(seg, 0.0)              # extrapolate above x_last
            else:
                seg = jnp.clip(seg, 0.0, x1 - x0)
            out = out + slope * seg
        return out

    def kernel(cxy_ref, M_ref, ib_ref, ob_ref, out_ref):
        cxy = cxy_ref[...]                    # (2N, K)
        M = M_ref[...]                        # (K, 3P)

        # Single fused MXU contraction: [pos | vel | accel] for x rows then y rows.
        full = jnp.dot(cxy, M, preferred_element_type=jnp.float32)    # (2N, 3P)
        px, vx, ax = full[:N, 0:P], full[:N, P:2 * P], full[:N, 2 * P:3 * P]
        py, vy, ay = full[N:, 0:P], full[N:, P:2 * P], full[N:, 2 * P:3 * P]

        # --- velocity / speed (EUP rsqrt, zero-speed guarded) ------------------
        v2 = vx * vx + vy * vy
        inv_speed = lax.rsqrt(jnp.maximum(v2, 1e-12))
        speeds = v2 * inv_speed                                        # (N, P)
        tx = vx * inv_speed
        ty = vy * inv_speed
        avg_speed = jnp.mean(speeds, axis=1, keepdims=True)            # (N, 1)

        # --- braking constraint -------------------------------------------------
        lin_acc = ax * tx + ay * ty                                    # (N, P)
        viol = jnp.minimum(lin_acc - braking_limit(speeds), 0.0)
        worst_brake = jnp.min(viol, axis=1, keepdims=True)             # (N, 1)

        # --- centripetal acceleration -------------------------------------------
        cax = ax - tx * lin_acc
        cay = ay - ty * lin_acc
        ca = jnp.sqrt(cax * cax + cay * cay)
        ca_max = jnp.max(ca, axis=1, keepdims=True)                    # (N, 1)

        # --- boundary signed distances (nearest boundary point + its normal) ----
        def boundary_max_signed(b_ref):
            b = b_ref[...]                     # (4, B): rows = x, y, nx, ny
            bx, by, nx, ny = b[0:1, :], b[1:2, :], b[2:3, :], b[3:4, :]
            dxm = px[:, :, None] - bx          # (N, P, B)
            dym = py[:, :, None] - by
            d2 = dxm * dxm + dym * dym
            mind = jnp.min(d2, axis=2, keepdims=True)
            sd = dxm * nx + dym * ny           # signed distance along each normal
            # sd at the argmin of d2 (ties: max over tied entries)
            sd_sel = jnp.max(jnp.where(d2 == mind, sd, -jnp.inf), axis=2)   # (N, P)
            return jnp.max(sd_sel, axis=1, keepdims=True)                    # (N, 1)

        ib_max = jnp.maximum(boundary_max_signed(ib_ref) - boundary_allowance, 0.0)
        ob_max = jnp.maximum(boundary_max_signed(ob_ref) - boundary_allowance, 0.0)
        overall_max = jnp.maximum(ib_max, ob_max)                      # (N, 1)

        # --- combined scores, log-space (== product-of-scores, renormalised) -----
        log_boundary = jnp.maximum(-beta_boundary * overall_max, LOG_MIN_BOUNDARY)
        logits = (beta_speed * avg_speed
                  + beta_brake * worst_brake
                  - beta_ca * jnp.maximum(ca_max - max_ca, 0.0)
                  + log_boundary)                                      # (N, 1)
        m = jnp.max(logits, axis=0, keepdims=True)
        e = jnp.exp(logits - m)
        denom = jnp.sum(e, axis=0, keepdims=True)                      # (1, 1)
        probs = e * pl.reciprocal(denom, approx=True)                  # (N, 1)

        # --- Bayesian (weighted) average of sampled curves, single full store ----
        wx = jnp.sum(probs * cxy[:N, :], axis=0, keepdims=True)        # (1, K)
        wy = jnp.sum(probs * cxy[N:, :], axis=0, keepdims=True)        # (1, K)
        out_ref[...] = jnp.concatenate([wx, wy], axis=0)               # (2, K)

    return kernel


def bayesian_filter(curve, noise, M_fused, ib_pack, ob_pack, *, num_points,
                    beta_speed=0.1, beta_ca=1.0, beta_brake=1.0, beta_boundary=1.0,
                    boundary_allowance=0.0, max_ca=19.6,
                    brake_xs=(0.0, 20.0, 40.0, 60.0, 80.0, 100.0),
                    brake_ys=(-38.0, -35.0, -32.0, -28.0, -24.0, -20.0)):
    """curve: (K, 2); noise: (N, K, 2).  Returns filtered curve (K, 2), float32."""
    N, K, _ = noise.shape

    # TODO(synk): torch.randn noise stream cannot be reproduced bit-for-bit; noise is
    # drawn with jax.random in the caller (same distribution / shapes).
    curves = curve[None, :, :] + noise                           # (N, K, 2)
    cxy = jnp.concatenate([curves[:, :, 0], curves[:, :, 1]], axis=0).astype(jnp.float32)

    kernel = _make_kernel(
        num_samples=N, num_points=num_points,
        beta_speed=float(beta_speed), beta_ca=float(beta_ca),
        beta_brake=float(beta_brake), beta_boundary=float(beta_boundary),
        boundary_allowance=float(boundary_allowance), max_ca=float(max_ca),
        brake_xs=tuple(float(x) for x in brake_xs),
        brake_ys=tuple(float(y) for y in brake_ys),
    )

    out = pl.pallas_call(
        kernel,
        out_shape=jax.ShapeDtypeStruct((2, K), jnp.float32),
        in_specs=[pl.BlockSpec(memory_space=pltpu.MemorySpace.VMEM)] * 4,
        out_specs=pl.BlockSpec(memory_space=pltpu.MemorySpace.VMEM),
    )(cxy, M_fused, ib_pack, ob_pack)

    return out.T   # (K, 2)


if __name__ == "__main__":
    BEZIER_ORDER = 5
    K = BEZIER_ORDER + 1          # control points per curve
    NUM_POINTS = 16               # samples along each bezier curve
    NUM_SAMPLES = 8               # Monte-Carlo curve samples
    NUM_BOUNDARY = 128            # boundary polyline points per boundary
    DELTA_T = 0.5

    # Fused (scaled) bezier basis / derivative matrices, built offline in float64.
    M_fused = make_fused_basis(BEZIER_ORDER, NUM_POINTS, DELTA_T)     # (K, 3P)

    # Synthetic track: inner circle r=25 (normals point away from track, inward),
    # outer circle r=35 (normals point away from track, outward).
    theta = np.linspace(0.0, 2.0 * np.pi, NUM_BOUNDARY, endpoint=False)
    r_in, r_out = 25.0, 35.0
    ib_pack = np.stack([r_in * np.cos(theta), r_in * np.sin(theta),
                        -np.cos(theta), -np.sin(theta)], axis=0)
    ob_pack = np.stack([r_out * np.cos(theta), r_out * np.sin(theta),
                        np.cos(theta), np.sin(theta)], axis=0)
    ib_pack = jnp.asarray(ib_pack, dtype=jnp.float32)   # (4, B)
    ob_pack = jnp.asarray(ob_pack, dtype=jnp.float32)   # (4, B)

    # Nominal curve: control points on an arc of radius 30 (between the boundaries).
    ang = np.linspace(0.0, 0.4, K)
    curve = jnp.asarray(np.stack([30.0 * np.cos(ang), 30.0 * np.sin(ang)], axis=1),
                        dtype=jnp.float32)              # (K, 2)

    # Gaussian perturbations (torch.randn equivalent, deterministic key).
    key = jax.random.PRNGKey(0)
    noise = jax.random.normal(key, (NUM_SAMPLES, K, 2), dtype=jnp.float32)

    filtered = bayesian_filter(
        curve, noise, M_fused, ib_pack, ob_pack,
        num_points=NUM_POINTS,
        beta_speed=0.1, beta_ca=1.0, beta_brake=1.0, beta_boundary=1.0,
        boundary_allowance=0.0, max_ca=19.6,
    )
    filtered = jax.block_until_ready(filtered)

    assert filtered.shape == (K, 2), filtered.shape
    assert bool(jnp.all(jnp.isfinite(filtered)))
    print("KERNEL_OK")
</pallas_src>

<mosaic_0001>
module attributes {stable_mosaic.version = 11 : i64} {
  func.func @kernel(%arg0: memref<16x6xf32, #tpu.memory_space<vmem>>, %arg1: memref<6x48xf32, #tpu.memory_space<vmem>>, %arg2: memref<4x128xf32, #tpu.memory_space<vmem>>, %arg3: memref<4x128xf32, #tpu.memory_space<vmem>>, %arg4: memref<2x6xf32, #tpu.memory_space<vmem>>) attributes {dimension_semantics = [], scalar_prefetch = 0 : i64, scratch_operands = 0 : i64, tpu.core_type = #tpu.core_type<tc>} {
    %c0 = arith.constant 0 : index
    %c0_0 = arith.constant 0 : index
    %0 = vector.load %arg0[%c0, %c0_0] : memref<16x6xf32, #tpu.memory_space<vmem>>, vector<16x6xf32>
    %c0_1 = arith.constant 0 : index
    %c0_2 = arith.constant 0 : index
    %1 = vector.load %arg1[%c0_1, %c0_2] : memref<6x48xf32, #tpu.memory_space<vmem>>, vector<6x48xf32>
    %cst = arith.constant dense<0.000000e+00> : vector<16x48xf32>
    %2 = tpu.matmul %0, %1, %cst {dimension_numbers = #tpu.dot_dimension_numbers<[1], [0], [0], [1], [0, 0, 1, 1], [], []>} : vector<16x6xf32>, vector<6x48xf32>, vector<16x48xf32> -> vector<16x48xf32>
    %3 = vector.extract_strided_slice %2 {offsets = [0, 0], sizes = [8, 16], strides = [1, 1]} : vector<16x48xf32> to vector<8x16xf32>
    %4 = vector.extract_strided_slice %2 {offsets = [0, 16], sizes = [8, 16], strides = [1, 1]} : vector<16x48xf32> to vector<8x16xf32>
    %5 = vector.extract_strided_slice %2 {offsets = [0, 32], sizes = [8, 16], strides = [1, 1]} : vector<16x48xf32> to vector<8x16xf32>
    %6 = vector.extract_strided_slice %2 {offsets = [8, 0], sizes = [8, 16], strides = [1, 1]} : vector<16x48xf32> to vector<8x16xf32>
    %7 = vector.extract_strided_slice %2 {offsets = [8, 16], sizes = [8, 16], strides = [1, 1]} : vector<16x48xf32> to vector<8x16xf32>
    %8 = vector.extract_strided_slice %2 {offsets = [8, 32], sizes = [8, 16], strides = [1, 1]} : vector<16x48xf32> to vector<8x16xf32>
    %9 = arith.mulf %4, %4 : vector<8x16xf32>
    %10 = arith.mulf %7, %7 : vector<8x16xf32>
    %11 = arith.addf %9, %10 : vector<8x16xf32>
    %cst_3 = arith.constant 9.99999996E-13 : f32
    %12 = vector.broadcast %cst_3 : f32 to vector<8x16xf32>
    %13 = arith.maximumf %11, %12 : vector<8x16xf32>
    %14 = math.rsqrt %13 : vector<8x16xf32>
    %15 = arith.mulf %11, %14 : vector<8x16xf32>
    %16 = arith.mulf %4, %14 : vector<8x16xf32>
    %17 = arith.mulf %7, %14 : vector<8x16xf32>
    %cst_4 = arith.constant dense<0.000000e+00> : vector<8xf32>
    %18 = vector.multi_reduction <add>, %15, %cst_4 [1] : vector<8x16xf32> to vector<8xf32>
    %19 = vector.shape_cast %18 : vector<8xf32> to vector<8x1xf32>
    %cst_5 = arith.constant 1.600000e+01 : f32
    %20 = vector.broadcast %cst_5 : f32 to vector<8x1xf32>
    %21 = arith.divf %19, %20 : vector<8x1xf32>
    %22 = arith.mulf %5, %16 : vector<8x16xf32>
    %23 = arith.mulf %8, %17 : vector<8x16xf32>
    %24 = arith.addf %22, %23 : vector<8x16xf32>
    %cst_6 = arith.constant -3.800000e+01 : f32
    %25 = vector.broadcast %cst_6 : f32 to vector<8x16xf32>
    %cst_7 = arith.constant 0.000000e+00 : f32
    %26 = vector.broadcast %cst_7 : f32 to vector<8x16xf32>
    %27 = arith.subf %15, %26 : vector<8x16xf32>
    %cst_8 = arith.constant 2.000000e+01 : f32
    %28 = vector.broadcast %cst_8 : f32 to vector<8x16xf32>
    %29 = arith.minimumf %27, %28 : vector<8x16xf32>
    %cst_9 = arith.constant 1.500000e-01 : f32
    %30 = vector.broadcast %cst_9 : f32 to vector<8x16xf32>
    %31 = arith.mulf %30, %29 : vector<8x16xf32>
    %32 = arith.addf %25, %31 : vector<8x16xf32>
    %cst_10 = arith.constant 2.000000e+01 : f32
    %33 = vector.broadcast %cst_10 : f32 to vector<8x16xf32>
    %34 = arith.subf %15, %33 : vector<8x16xf32>
    %cst_11 = arith.constant 0.000000e+00 : f32
    %cst_12 = arith.constant 2.000000e+01 : f32
    %35 = vector.broadcast %cst_11 : f32 to vector<8x16xf32>
    %36 = arith.maximumf %35, %34 : vector<8x16xf32>
    %37 = vector.broadcast %cst_12 : f32 to vector<8x16xf32>
    %38 = arith.minimumf %37, %36 : vector<8x16xf32>
    %cst_13 = arith.constant 1.500000e-01 : f32
    %39 = vector.broadcast %cst_13 : f32 to vector<8x16xf32>
    %40 = arith.mulf %39, %38 : vector<8x16xf32>
    %41 = arith.addf %32, %40 : vector<8x16xf32>
    %cst_14 = arith.constant 4.000000e+01 : f32
    %42 = vector.broadcast %cst_14 : f32 to vector<8x16xf32>
    %43 = arith.subf %15, %42 : vector<8x16xf32>
    %cst_15 = arith.constant 0.000000e+00 : f32
    %cst_16 = arith.constant 2.000000e+01 : f32
    %44 = vector.broadcast %cst_15 : f32 to vector<8x16xf32>
    %45 = arith.maximumf %44, %43 : vector<8x16xf32>
    %46 = vector.broadcast %cst_16 : f32 to vector<8x16xf32>
    %47 = arith.minimumf %46, %45 : vector<8x16xf32>
    %cst_17 = arith.constant 2.000000e-01 : f32
    %48 = vector.broadcast %cst_17 : f32 to vector<8x16xf32>
    %49 = arith.mulf %48, %47 : vector<8x16xf32>
    %50 = arith.addf %41, %49 : vector<8x16xf32>
    %cst_18 = arith.constant 6.000000e+01 : f32
    %51 = vector.broadcast %cst_18 : f32 to vector<8x16xf32>
    %52 = arith.subf %15, %51 : vector<8x16xf32>
    %cst_19 = arith.constant 0.000000e+00 : f32
    %cst_20 = arith.constant 2.000000e+01 : f32
    %53 = vector.broadcast %cst_19 : f32 to vector<8x16xf32>
    %54 = arith.maximumf %53, %52 : vector<8x16xf32>
    %55 = vector.broadcast %cst_20 : f32 to vector<8x16xf32>
    %56 = arith.minimumf %55, %54 : vector<8x16xf32>
    %cst_21 = arith.constant 2.000000e-01 : f32
    %57 = vector.broadcast %cst_21 : f32 to vector<8x16xf32>
    %58 = arith.mulf %57, %56 : vector<8x16xf32>
    %59 = arith.addf %50, %58 : vector<8x16xf32>
    %cst_22 = arith.constant 8.000000e+01 : f32
    %60 = vector.broadcast %cst_22 : f32 to vector<8x16xf32>
    %61 = arith.subf %15, %60 : vector<8x16xf32>
    %cst_23 = arith.constant 0.000000e+00 : f32
    %62 = vector.broadcast %cst_23 : f32 to vector<8x16xf32>
    %63 = arith.maximumf %61, %62 : vector<8x16xf32>
    %cst_24 = arith.constant 2.000000e-01 : f32
    %64 = vector.broadcast %cst_24 : f32 to vector<8x16xf32>
    %65 = arith.mulf %64, %63 : vector<8x16xf32>
    %66 = arith.addf %59, %65 : vector<8x16xf32>
    %67 = arith.subf %24, %66 : vector<8x16xf32>
    %cst_25 = arith.constant 0.000000e+00 : f32
    %68 = vector.broadcast %cst_25 : f32 to vector<8x16xf32>
    %69 = arith.minimumf %67, %68 : vector<8x16xf32>
    %cst_26 = arith.constant dense<0x7F800000> : vector<8xf32>
    %70 = vector.multi_reduction <minimumf>, %69, %cst_26 [1] : vector<8x16xf32> to vector<8xf32>
    %71 = vector.shape_cast %70 : vector<8xf32> to vector<8x1xf32>
    %72 = arith.mulf %16, %24 : vector<8x16xf32>
    %73 = arith.subf %5, %72 : vector<8x16xf32>
    %74 = arith.mulf %17, %24 : vector<8x16xf32>
    %75 = arith.subf %8, %74 : vector<8x16xf32>
    %76 = arith.mulf %73, %73 : vector<8x16xf32>
    %77 = arith.mulf %75, %75 : vector<8x16xf32>
    %78 = arith.addf %76, %77 : vector<8x16xf32>
    %79 = math.sqrt %78 : vector<8x16xf32>
    %cst_27 = arith.constant dense<0xFF800000> : vector<8xf32>
    %80 = vector.multi_reduction <maximumf>, %79, %cst_27 [1] : vector<8x16xf32> to vector<8xf32>
    %81 = vector.shape_cast %80 : vector<8xf32> to vector<8x1xf32>
    %c0_28 = arith.constant 0 : index
    %c0_29 = arith.constant 0 : index
    %82 = vector.load %arg2[%c0_28, %c0_29] : memref<4x128xf32, #tpu.memory_space<vmem>>, vector<4x128xf32>
    %83 = vector.extract_strided_slice %82 {offsets = [0, 0], sizes = [1, 128], strides = [1, 1]} : vector<4x128xf32> to vector<1x128xf32>
    %84 = vector.extract_strided_slice %82 {offsets = [1, 0], sizes = [1, 128], strides = [1, 1]} : vector<4x128xf32> to vector<1x128xf32>
    %85 = vector.extract_strided_slice %82 {offsets = [2, 0], sizes = [1, 128], strides = [1, 1]} : vector<4x128xf32> to vector<1x128xf32>
    %86 = vector.extract_strided_slice %82 {offsets = [3, 0], sizes = [1, 128], strides = [1, 1]} : vector<4x128xf32> to vector<1x128xf32>
    %87 = vector.shape_cast %3 : vector<8x16xf32> to vector<8x16x1xf32>
    %88 = vector.shape_cast %83 : vector<1x128xf32> to vector<1x1x128xf32>
    %89 = vector.broadcast %87 : vector<8x16x1xf32> to vector<8x16x128xf32>
    %90 = vector.broadcast %88 : vector<1x1x128xf32> to vector<8x16x128xf32>
    %91 = arith.subf %89, %90 : vector<8x16x128xf32>
    %92 = vector.shape_cast %6 : vector<8x16xf32> to vector<8x16x1xf32>
    %93 = vector.shape_cast %84 : vector<1x128xf32> to vector<1x1x128xf32>
    %94 = vector.broadcast %92 : vector<8x16x1xf32> to vector<8x16x128xf32>
    %95 = vector.broadcast %93 : vector<1x1x128xf32> to vector<8x16x128xf32>
    %96 = arith.subf %94, %95 : vector<8x16x128xf32>
    %97 = arith.mulf %91, %91 : vector<8x16x128xf32>
    %98 = arith.mulf %96, %96 : vector<8x16x128xf32>
    %99 = arith.addf %97, %98 : vector<8x16x128xf32>
    %cst_30 = arith.constant dense<0x7F800000> : vector<8x16xf32>
    %100 = vector.multi_reduction <minimumf>, %99, %cst_30 [2] : vector<8x16x128xf32> to vector<8x16xf32>
    %101 = vector.shape_cast %100 : vector<8x16xf32> to vector<8x16x1xf32>
    %102 = vector.shape_cast %85 : vector<1x128xf32> to vector<1x1x128xf32>
    %103 = vector.broadcast %102 : vector<1x1x128xf32> to vector<8x16x128xf32>
    %104 = arith.mulf %91, %103 : vector<8x16x128xf32>
    %105 = vector.shape_cast %86 : vector<1x128xf32> to vector<1x1x128xf32>
    %106 = vector.broadcast %105 : vector<1x1x128xf32> to vector<8x16x128xf32>
    %107 = arith.mulf %96, %106 : vector<8x16x128xf32>
    %108 = arith.addf %104, %107 : vector<8x16x128xf32>
    %109 = vector.broadcast %101 : vector<8x16x1xf32> to vector<8x16x128xf32>
    %110 = arith.cmpf oeq, %99, %109 : vector<8x16x128xf32>
    %cst_31 = arith.constant 0xFF800000 : f32
    %111 = vector.broadcast %cst_31 : f32 to vector<8x16x128xf32>
    %112 = arith.select %110, %108, %111 : vector<8x16x128xi1>, vector<8x16x128xf32>
    %cst_32 = arith.constant dense<0xFF800000> : vector<8x16xf32>
    %113 = vector.multi_reduction <maximumf>, %112, %cst_32 [2] : vector<8x16x128xf32> to vector<8x16xf32>
    %cst_33 = arith.constant dense<0xFF800000> : vector<8xf32>
    %114 = vector.multi_reduction <maximumf>, %113, %cst_33 [1] : vector<8x16xf32> to vector<8xf32>
    %115 = vector.shape_cast %114 : vector<8xf32> to vector<8x1xf32>
    %cst_34 = arith.constant 0.000000e+00 : f32
    %116 = vector.broadcast %cst_34 : f32 to vector<8x1xf32>
    %117 = arith.subf %115, %116 : vector<8x1xf32>
    %cst_35 = arith.constant 0.000000e+00 : f32
    %118 = vector.broadcast %cst_35 : f32 to vector<8x1xf32>
    %119 = arith.maximumf %117, %118 : vector<8x1xf32>
    %c0_36 = arith.constant 0 : index
    %c0_37 = arith.constant 0 : index
    %120 = vector.load %arg3[%c0_36, %c0_37] : memref<4x128xf32, #tpu.memory_space<vmem>>, vector<4x128xf32>
    %121 = vector.extract_strided_slice %120 {offsets = [0, 0], sizes = [1, 128], strides = [1, 1]} : vector<4x128xf32> to vector<1x128xf32>
    %122 = vector.extract_strided_slice %120 {offsets = [1, 0], sizes = [1, 128], strides = [1, 1]} : vector<4x128xf32> to vector<1x128xf32>
    %123 = vector.extract_strided_slice %120 {offsets = [2, 0], sizes = [1, 128], strides = [1, 1]} : vector<4x128xf32> to vector<1x128xf32>
    %124 = vector.extract_strided_slice %120 {offsets = [3, 0], sizes = [1, 128], strides = [1, 1]} : vector<4x128xf32> to vector<1x128xf32>
    %125 = vector.shape_cast %3 : vector<8x16xf32> to vector<8x16x1xf32>
    %126 = vector.shape_cast %121 : vector<1x128xf32> to vector<1x1x128xf32>
    %127 = vector.broadcast %125 : vector<8x16x1xf32> to vector<8x16x128xf32>
    %128 = vector.broadcast %126 : vector<1x1x128xf32> to vector<8x16x128xf32>
    %129 = arith.subf %127, %128 : vector<8x16x128xf32>
    %130 = vector.shape_cast %6 : vector<8x16xf32> to vector<8x16x1xf32>
    %131 = vector.shape_cast %122 : vector<1x128xf32> to vector<1x1x128xf32>
    %132 = vector.broadcast %130 : vector<8x16x1xf32> to vector<8x16x128xf32>
    %133 = vector.broadcast %131 : vector<1x1x128xf32> to vector<8x16x128xf32>
    %134 = arith.subf %132, %133 : vector<8x16x128xf32>
    %135 = arith.mulf %129, %129 : vector<8x16x128xf32>
    %136 = arith.mulf %134, %134 : vector<8x16x128xf32>
    %137 = arith.addf %135, %136 : vector<8x16x128xf32>
    %cst_38 = arith.constant dense<0x7F800000> : vector<8x16xf32>
    %138 = vector.multi_reduction <minimumf>, %137, %cst_38 [2] : vector<8x16x128xf32> to vector<8x16xf32>
    %139 = vector.shape_cast %138 : vector<8x16xf32> to vector<8x16x1xf32>
    %140 = vector.shape_cast %123 : vector<1x128xf32> to vector<1x1x128xf32>
    %141 = vector.broadcast %140 : vector<1x1x128xf32> to vector<8x16x128xf32>
    %142 = arith.mulf %129, %141 : vector<8x16x128xf32>
    %143 = vector.shape_cast %124 : vector<1x128xf32> to vector<1x1x128xf32>
    %144 = vector.broadcast %143 : vector<1x1x128xf32> to vector<8x16x128xf32>
    %145 = arith.mulf %134, %144 : vector<8x16x128xf32>
    %146 = arith.addf %142, %145 : vector<8x16x128xf32>
    %147 = vector.broadcast %139 : vector<8x16x1xf32> to vector<8x16x128xf32>
    %148 = arith.cmpf oeq, %137, %147 : vector<8x16x128xf32>
    %cst_39 = arith.constant 0xFF800000 : f32
    %149 = vector.broadcast %cst_39 : f32 to vector<8x16x128xf32>
    %150 = arith.select %148, %146, %149 : vector<8x16x128xi1>, vector<8x16x128xf32>
    %cst_40 = arith.constant dense<0xFF800000> : vector<8x16xf32>
    %151 = vector.multi_reduction <maximumf>, %150, %cst_40 [2] : vector<8x16x128xf32> to vector<8x16xf32>
    %cst_41 = arith.constant dense<0xFF800000> : vector<8xf32>
    %152 = vector.multi_reduction <maximumf>, %151, %cst_41 [1] : vector<8x16xf32> to vector<8xf32>
    %153 = vector.shape_cast %152 : vector<8xf32> to vector<8x1xf32>
    %cst_42 = arith.constant 0.000000e+00 : f32
    %154 = vector.broadcast %cst_42 : f32 to vector<8x1xf32>
    %155 = arith.subf %153, %154 : vector<8x1xf32>
    %cst_43 = arith.constant 0.000000e+00 : f32
    %156 = vector.broadcast %cst_43 : f32 to vector<8x1xf32>
    %157 = arith.maximumf %155, %156 : vector<8x1xf32>
    %158 = arith.maximumf %119, %157 : vector<8x1xf32>
    %cst_44 = arith.constant -1.000000e+00 : f32
    %159 = vector.broadcast %cst_44 : f32 to vector<8x1xf32>
    %160 = arith.mulf %159, %158 : vector<8x1xf32>
    %cst_45 = arith.constant -73.6827239 : f32
    %161 = vector.broadcast %cst_45 : f32 to vector<8x1xf32>
    %162 = arith.maximumf %160, %161 : vector<8x1xf32>
    %cst_46 = arith.constant 1.000000e-01 : f32
    %163 = vector.broadcast %cst_46 : f32 to vector<8x1xf32>
    %164 = arith.mulf %163, %21 : vector<8x1xf32>
    %cst_47 = arith.constant 1.000000e+00 : f32
    %165 = vector.broadcast %cst_47 : f32 to vector<8x1xf32>
    %166 = arith.mulf %165, %71 : vector<8x1xf32>
    %167 = arith.addf %164, %166 : vector<8x1xf32>
    %cst_48 = arith.constant 1.960000e+01 : f32
    %168 = vector.broadcast %cst_48 : f32 to vector<8x1xf32>
    %169 = arith.subf %81, %168 : vector<8x1xf32>
    %cst_49 = arith.constant 0.000000e+00 : f32
    %170 = vector.broadcast %cst_49 : f32 to vector<8x1xf32>
    %171 = arith.maximumf %169, %170 : vector<8x1xf32>
    %cst_50 = arith.constant 1.000000e+00 : f32
    %172 = vector.broadcast %cst_50 : f32 to vector<8x1xf32>
    %173 = arith.mulf %172, %171 : vector<8x1xf32>
    %174 = arith.subf %167, %173 : vector<8x1xf32>
    %175 = arith.addf %174, %162 : vector<8x1xf32>
    %cst_51 = arith.constant dense<0xFF800000> : vector<1xf32>
    %176 = vector.multi_reduction <maximumf>, %175, %cst_51 [0] : vector<8x1xf32> to vector<1xf32>
    %177 = vector.shape_cast %176 : vector<1xf32> to vector<1x1xf32>
    %178 = vector.broadcast %177 : vector<1x1xf32> to vector<8x1xf32>
    %179 = arith.subf %175, %178 : vector<8x1xf32>
    %180 = math.exp %179 : vector<8x1xf32>
    %cst_52 = arith.constant dense<0.000000e+00> : vector<1xf32>
    %181 = vector.multi_reduction <add>, %180, %cst_52 [0] : vector<8x1xf32> to vector<1xf32>
    %182 = vector.shape_cast %181 : vector<1xf32> to vector<1x1xf32>
    %183 = tpu.reciprocal %182 {approx = true} : vector<1x1xf32> -> vector<1x1xf32>
    %184 = vector.broadcast %183 : vector<1x1xf32> to vector<8x1xf32>
    %185 = arith.mulf %180, %184 : vector<8x1xf32>
    %186 = vector.extract_strided_slice %0 {offsets = [0, 0], sizes = [8, 6], strides = [1, 1]} : vector<16x6xf32> to vector<8x6xf32>
    %187 = vector.broadcast %185 : vector<8x1xf32> to vector<8x6xf32>
    %188 = arith.mulf %187, %186 : vector<8x6xf32>
    %cst_53 = arith.constant dense<0.000000e+00> : vector<6xf32>
    %189 = vector.multi_reduction <add>, %188, %cst_53 [0] : vector<8x6xf32> to vector<6xf32>
    %190 = vector.shape_cast %189 : vector<6xf32> to vector<1x6xf32>
    %191 = vector.extract_strided_slice %0 {offsets = [8, 0], sizes = [8, 6], strides = [1, 1]} : vector<16x6xf32> to vector<8x6xf32>
    %192 = vector.broadcast %185 : vector<8x1xf32> to vector<8x6xf32>
    %193 = arith.mulf %192, %191 : vector<8x6xf32>
    %cst_54 = arith.constant dense<0.000000e+00> : vector<6xf32>
    %194 = vector.multi_reduction <add>, %193, %cst_54 [0] : vector<8x6xf32> to vector<6xf32>
    %195 = vector.shape_cast %194 : vector<6xf32> to vector<1x6xf32>
    %196 = tpu.concatenate %190, %195 in 0 : vector<1x6xf32>, vector<1x6xf32> -> vector<2x6xf32>
    %c0_55 = arith.constant 0 : index
    %c0_56 = arith.constant 0 : index
    %197 = vector.load %arg4[%c0_55, %c0_56] : memref<2x6xf32, #tpu.memory_space<vmem>>, vector<2x6xf32>
    tpu.vector_store %arg4[%c0_55, %c0_56], %196 {strides = array<i32>} : memref<2x6xf32, #tpu.memory_space<vmem>>, vector<2x6xf32>,
    return
  }
}

</mosaic_0001>

<bundles_post_ra>
// kernel: tpu_custom_call.1
= control target key start
LH: loop header
LB: loop body
LE: loop exit
PB: predicated region body
PF: predicated region fallthrough
CT: control target
= control target key end

     0   :  { %vm28_vm0 = vcmask 1045504   ;;  %vm21_vm1 = vcmask 48128   ;;  %s2231_s0 = inlined_call_operand.vmem [shape: f32[16,6], index: 0, kind: input, shape index: {}]   ;;  %s2232_s1 = inlined_call_operand.vmem [shape: f32[6,48], index: 1, kind: input, shape index: {}]   ;;  %s2233_s2 = inlined_call_operand.vmem [shape: f32[4,128], index: 2, kind: input, shape index: {}]   ;;  %s2234_s3 = inlined_call_operand.vmem [shape: f32[4,128], index: 3, kind: input, shape index: {}]   ;;  %s2235_s4 = inlined_call_operand.hbm [shape: f32[2,6], index: 4, kind: output, shape index: {}]  }
   0x1   :  { %v20_v0 = vld [vmem:[%s2232_s1] sm:$0x3f]  ;;  %v19_v2 = vld [vmem:[%s2231_s0 + $0x8] sm:$0xff] }
   0x2   :  { %v18_v1 = vld [vmem:[%s2231_s0] sm:$0xff]  ;;  %1137 = vmatprep.subr.msk.mxu0 %vm28_vm0, %v20_v0 }
   0x3   :  { %1139 = vmatprep.mubr.msk.f32.mxu0 %vm21_vm1, %v18_v1 }
   0x4   :  { %9 = vsyncpa [#allocation3], 0  ;;  %1138 = vmatpush3.msk.msra.mxu0 %vm28_vm0, %v20_v0  ;;  %v198_v3 = vlaneseq  ;;  %s1177_s1 = smov 16   ;;  %v1283_v43 = vld [vmem:[%s2233_s2] sm:$0xf]  ;;  %s1178_s2 = smov 112  }
   0x5   :  { %1140 = vmatmul.mubr.msk.f32.vlgmr.msra.gmra.mxu0 %vm21_vm1, %v19_v2  ;;  %v1288_v44 = vld [vmem:[%s2234_s3] sm:$0xf]  ;;  %s1179_s28 = smov [#allocation2]  }
   0x6   :  { %v1216_v4 = vshrl.u32 %v198_v3, 7  ;;  %v631_v5 = vand.u32 127, %v198_v3  ;;  %s1118_s29 = sshll.u32 %s1179_s28, 4  ;;  %s1119_s29 = int_to_ptr.vmem [resolvable:$true] %s1118_s29 }
   0x7   :  { %p1160_p1 = scmp.lt.s32.totalorder %s1119_s29, %s1119_s29 }
   0x8   :  { %v1219_v6 = vsub.s32 %v631_v5, %v1216_v4  ;;  %v636_v7 = vadd.s32 4294967288, %v631_v5  ;;  %v1225_v9 = vsub.s32 0, %v1216_v4  ;;  %v1232_v12 = vsub.s32 1, %v1216_v4 }
   0x9   :  { %v1243_v18 = vsub.s32 2, %v1216_v4  ;;  %v233_v21 = vsub.s32 3, %v1216_v4  ;;  %v244_v23 = vsub.s32 4, %v1216_v4  ;;  %v255_v25 = vsub.s32 5, %v1216_v4 }
   0xa   :  { %2276 = vst [vmem:[#allocation5_spill] sm:$0xff] %v1219_v6  ;;  %v1222_v8 = vsub.s32 %v636_v7, %v1216_v4  ;;  %v266_v27 = vsub.s32 6, %v1216_v4  ;;  %v277_v31 = vsub.s32 7, %v1216_v4  ;;  %v1292_v45 = vrot.slane %v1283_v43, %v1232_v12 }
   0xb   :  { %v1296_v46 = vrot.slane %v1288_v44, %v1232_v12  ;;  %v1299_v47 = vrot.slane %v1283_v43, %v233_v21  ;;  %v1302_v48 = vrot.slane %v1288_v44, %v233_v21 }
   0xc   :  { %2277 = vst [vmem:[#allocation6_spill] sm:$0xff] %v1222_v8 }
  0xc5   :  { %v1227_v10 = vpop.f32.mrf.mxu0 }
  0xc6   :  { %2278 = vst [vmem:[#allocation7_spill] sm:$0xff] %v1227_v10  ;;  %v309_v11 = vrot.slane %v1227_v10, %v1225_v9  ;;  %v108_v15 = vmul.f32 %v1227_v10, %v1227_v10  ;;  %v320_v17 = vrot.slane %v1227_v10, %v1232_v12  ;;  %v331_v20 = vrot.slane %v1227_v10, %v1243_v18 }
  0xc7   :  { %v1234_v13 = vpop.f32.mrf.mxu0  ;;  %v342_v22 = vrot.slane %v1227_v10, %v233_v21  ;;  %v353_v24 = vrot.slane %v1227_v10, %v244_v23  ;;  %v364_v26 = vrot.slane %v1227_v10, %v255_v25  ;;  %v375_v30 = vrot.slane %v1227_v10, %v266_v27 }
  0xc8   :  { %2279 = vst [vmem:[#allocation8_spill] sm:$0xff] %v1234_v13  ;;  %v107_v14 = vmul.f32 %v1234_v13, %v1234_v13  ;;  %315 = vbcast.lane.b32.xlu1 %v309_v11, 264  ;;  %311 = vbcast.lane.b32.xlu0 %v309_v11, 256  ;;  %v386_v32 = vrot.slane %v1227_v10, %v277_v31 }
  0xc9   :  { %v212_v33 = vrot.slane %v1234_v13, %v1232_v12  ;;  %v201_v34 = vrot.slane %v1234_v13, %v1225_v9  ;;  %v223_v35 = vrot.slane %v1234_v13, %v1243_v18  ;;  %v234_v36 = vrot.slane %v1234_v13, %v233_v21 }
  0xca   :  { %v109_v16 = vadd.f32 %v108_v15, %v107_v14  ;;  %v245_v37 = vrot.slane %v1234_v13, %v244_v23  ;;  %v256_v38 = vrot.slane %v1234_v13, %v255_v25  ;;  %v267_v39 = vrot.slane %v1234_v13, %v266_v27 }
  0xcb   :  { %v278_v40 = vrot.slane %v1234_v13, %v277_v31 }
  0xcc   :  { %326 = vbcast.lane.b32.xlu1 %v320_v17, 264  ;;  %322 = vbcast.lane.b32.xlu0 %v320_v17, 256  ;;  %v110_v19 = vmax.f32 %v109_v16, 1e-12 }
  0xce   :  { %1145 = vrsqrt.f32 %v110_v19 }
  0xd0   :  { %337 = vbcast.lane.b32.xlu1 %v331_v20, 264  ;;  %333 = vbcast.lane.b32.xlu0 %v331_v20, 256 }
  0xd4   :  { %348 = vbcast.lane.b32.xlu1 %v342_v22, 264  ;;  %344 = vbcast.lane.b32.xlu0 %v342_v22, 256 }
  0xd8   :  { %359 = vbcast.lane.b32.xlu1 %v353_v24, 264  ;;  %355 = vbcast.lane.b32.xlu0 %v353_v24, 256 }
  0xdb   :  { %v1146_v28 = vpop.eup %1145 }
  0xdc   :  { %370 = vbcast.lane.b32.xlu1 %v364_v26, 264  ;;  %366 = vbcast.lane.b32.xlu0 %v364_v26, 256  ;;  %v1254_v29 = vmul.f32 %v1146_v28, %v109_v16  ;;  %v1271_v41 = vmul.f32 %v1146_v28, %v1227_v10  ;;  %v1274_v42 = vmul.f32 %v1146_v28, %v1234_v13 }
  0xde   :  { %2280 = vst [vmem:[#allocation9_spill] sm:$0xff] %v1254_v29  ;;  %2281 = vst [vmem:[#allocation10_spill] sm:$0xff] %v1271_v41 }
  0xdf   :  { %2282 = vst [vmem:[#allocation11_spill] sm:$0xff] %v1274_v42 }
  0xe0   :  { %381 = vbcast.lane.b32.xlu1 %v375_v30, 264  ;;  %377 = vbcast.lane.b32.xlu0 %v375_v30, 256 }
  0xe4   :  { %392 = vbcast.lane.b32.xlu1 %v386_v32, 264  ;;  %388 = vbcast.lane.b32.xlu0 %v386_v32, 256 }
  0xe8   :  { %214 = vbcast.lane.b32.xlu1 %v212_v33, 256  ;;  %203 = vbcast.lane.b32.xlu0 %v201_v34, 256 }
  0xec   :  { %218 = vbcast.lane.b32.xlu1 %v212_v33, 264  ;;  %207 = vbcast.lane.b32.xlu0 %v201_v34, 264 }
  0xf0   :  { %229 = vbcast.lane.b32.xlu1 %v223_v35, 264  ;;  %225 = vbcast.lane.b32.xlu0 %v223_v35, 256 }
  0xf4   :  { %240 = vbcast.lane.b32.xlu1 %v234_v36, 264  ;;  %236 = vbcast.lane.b32.xlu0 %v234_v36, 256 }
  0xf8   :  { %251 = vbcast.lane.b32.xlu1 %v245_v37, 264  ;;  %247 = vbcast.lane.b32.xlu0 %v245_v37, 256 }
  0xfc   :  { %262 = vbcast.lane.b32.xlu1 %v256_v38, 264  ;;  %258 = vbcast.lane.b32.xlu0 %v256_v38, 256 }
 0x100   :  { %273 = vbcast.lane.b32.xlu1 %v267_v39, 264  ;;  %269 = vbcast.lane.b32.xlu0 %v267_v39, 256 }
 0x104   :  { %284 = vbcast.lane.b32.xlu1 %v278_v40, 264  ;;  %280 = vbcast.lane.b32.xlu0 %v278_v40, 256 }
 0x108   :  { %131 = vrot.lane.b32.xlu1 %v1271_v41, %s1177_s1  ;;  %126 = vrot.lane.b32.xlu0 %v1274_v42, %s1177_s1 }
 0x13a   :  { %v316_v49 = vpop.permute.xlu1 %315  ;;  %v312_v50 = vpop.permute.xlu0 %311 }
 0x13b   :  { %v1305_v51 = vsub.f32 %v316_v49, %v1292_v45  ;;  %v1308_v52 = vsub.f32 %v316_v49, %v1296_v46  ;;  %v1311_v53 = vsub.f32 %v312_v50, %v1292_v45  ;;  %v1314_v54 = vsub.f32 %v312_v50, %v1296_v46 }
 0x13d   :  { %v1318_v57 = vmul.f32 %v1299_v47, %v1305_v51  ;;  %v1322_v58 = vmul.f32 %v1299_v47, %v1311_v53  ;;  %v1326_v59 = vmul.f32 %v1302_v48, %v1314_v54  ;;  %v1330_v60 = vmul.f32 %v1302_v48, %v1308_v52 }
 0x13e   :  { %v327_v55 = vpop.permute.xlu1 %326  ;;  %v323_v56 = vpop.permute.xlu0 %322 }
 0x13f   :  { %v1333_v61 = vsub.f32 %v327_v55, %v1292_v45  ;;  %v1336_v62 = vsub.f32 %v327_v55, %v1296_v46  ;;  %v1339_v63 = vsub.f32 %v323_v56, %v1292_v45  ;;  %v1342_v0 = vsub.f32 %v323_v56, %v1296_v46 }
 0x141   :  { %v1346_v3 = vmul.f32 %v1299_v47, %v1339_v63  ;;  %v1350_v4 = vmul.f32 %v1299_v47, %v1333_v61  ;;  %v1354_v5 = vmul.f32 %v1302_v48, %v1342_v0  ;;  %v1358_v7 = vmul.f32 %v1302_v48, %v1336_v62 }
 0x142   :  { %v338_v1 = vpop.permute.xlu1 %337  ;;  %v334_v2 = vpop.permute.xlu0 %333 }
 0x143   :  { %v1361_v11 = vsub.f32 %v338_v1, %v1292_v45  ;;  %v1364_v12 = vsub.f32 %v338_v1, %v1296_v46  ;;  %v1367_v14 = vsub.f32 %v334_v2, %v1292_v45  ;;  %v1370_v15 = vsub.f32 %v334_v2, %v1296_v46 }
 0x145   :  { %v1374_v19 = vmul.f32 %v1299_v47, %v1367_v14  ;;  %v1378_v20 = vmul.f32 %v1302_v48, %v1370_v15  ;;  %v1382_v21 = vmul.f32 %v1299_v47, %v1361_v11  ;;  %v1386_v22 = vmul.f32 %v1302_v48, %v1364_v12 }
 0x146   :  { %v349_v16 = vpop.permute.xlu1 %348  ;;  %v345_v17 = vpop.permute.xlu0 %344 }
 0x147   :  { %2283 = vst [vmem:[#allocation12_spill] sm:$0xff] %v1378_v20  ;;  %2284 = vst [vmem:[#allocation13_spill] sm:$0xff] %v1382_v21  ;;  %v1389_v23 = vsub.f32 %v349_v16, %v1292_v45  ;;  %v1392_v24 = vsub.f32 %v349_v16, %v1296_v46  ;;  %v1395_v25 = vsub.f32 %v345_v17, %v1292_v45 }
 0x148   :  { %2285 = vst [vmem:[#allocation14_spill] sm:$0xff] %v1386_v22  ;;  %v1398_v26 = vsub.f32 %v345_v17, %v1296_v46 }
 0x149   :  { %v1402_v30 = vmul.f32 %v1299_v47, %v1395_v25  ;;  %v1410_v32 = vmul.f32 %v1299_v47, %v1389_v23  ;;  %v1414_v33 = vmul.f32 %v1302_v48, %v1392_v24 }
 0x14a   :  { %v360_v27 = vpop.permute.xlu1 %359  ;;  %v356_v28 = vpop.permute.xlu0 %355  ;;  %v1406_v31 = vmul.f32 %v1302_v48, %v1398_v26 }
 0x14b   :  { %2286 = vst [vmem:[#allocation15_spill] sm:$0xff] %v1402_v30  ;;  %2288 = vst [vmem:[#allocation17_spill] sm:$0xff] %v1410_v32  ;;  %v1417_v34 = vsub.f32 %v360_v27, %v1292_v45  ;;  %v1420_v35 = vsub.f32 %v360_v27, %v1296_v46  ;;  %v1423_v36 = vsub.f32 %v356_v28, %v1292_v45 }
 0x14c   :  { %2287 = vst [vmem:[#allocation16_spill] sm:$0xff] %v1406_v31  ;;  %2289 = vst [vmem:[#allocation18_spill] sm:$0xff] %v1414_v33  ;;  %v1426_v37 = vsub.f32 %v356_v28, %v1296_v46 }
 0x14d   :  { %v1430_v38 = vmul.f32 %v1299_v47, %v1417_v34  ;;  %v1434_v39 = vmul.f32 %v1302_v48, %v1420_v35  ;;  %v1438_v50 = vmul.f32 %v1299_v47, %v1423_v36 }
 0x14e   :  { %v371_v40 = vpop.permute.xlu1 %370  ;;  %v367_v49 = vpop.permute.xlu0 %366  ;;  %v1442_v55 = vmul.f32 %v1302_v48, %v1426_v37 }
 0x14f   :  { %2290 = vst [vmem:[#allocation19_spill] sm:$0xff] %v1430_v38  ;;  %2291 = vst [vmem:[#allocation20_spill] sm:$0xff] %v1434_v39  ;;  %v1445_v56 = vsub.f32 %v371_v40, %v1292_v45  ;;  %v1448_v1 = vsub.f32 %v371_v40, %v1296_v46  ;;  %v1451_v2 = vsub.f32 %v367_v49, %v1292_v45 }
 0x150   :  { %2292 = vst [vmem:[#allocation21_spill] sm:$0xff] %v1438_v50  ;;  %2293 = vst [vmem:[#allocation22_spill] sm:$0xff] %v1442_v55  ;;  %v1454_v16 = vsub.f32 %v367_v49, %v1296_v46 }
 0x151   :  { %2294 = vst [vmem:[#allocation23_spill] sm:$0xff] %v1445_v56  ;;  %2295 = vst [vmem:[#allocation24_spill] sm:$0xff] %v1448_v1  ;;  %v1458_v17 = vmul.f32 %v1299_v47, %v1445_v56  ;;  %v1462_v27 = vmul.f32 %v1302_v48, %v1448_v1  ;;  %v1466_v40 = vmul.f32 %v1299_v47, %v1451_v2 }
 0x152   :  { %2296 = vst [vmem:[#allocation25_spill] sm:$0xff] %v1454_v16  ;;  %v382_v28 = vpop.permute.xlu1 %381  ;;  %v378_v6 = vpop.permute.xlu0 %377  ;;  %v1470_v8 = vmul.f32 %v1302_v48, %v1454_v16 }
 0x153   :  { %2297 = vst [vmem:[#allocation26_spill] sm:$0xff] %v1458_v17  ;;  %2298 = vst [vmem:[#allocation27_spill] sm:$0xff] %v1462_v27  ;;  %v1473_v49 = vsub.f32 %v382_v28, %v1292_v45  ;;  %v1476_v29 = vsub.f32 %v382_v28, %v1296_v46  ;;  %v1479_v41 = vsub.f32 %v378_v6, %v1292_v45 }
 0x154   :  { %2299 = vst [vmem:[#allocation28_spill] sm:$0xff] %v1466_v40  ;;  %2300 = vst [vmem:[#allocation29_spill] sm:$0xff] %v1470_v8  ;;  %v1482_v42 = vsub.f32 %v378_v6, %v1296_v46  ;;  %v1502_v6 = vrot.slane %v1283_v43, %v1225_v9 }
 0x155   :  { %2301 = vst [vmem:[#allocation30_spill] sm:$0xff] %v1473_v49  ;;  %2302 = vst [vmem:[#allocation31_spill] sm:$0xff] %v1476_v29  ;;  %v1486_v13 = vmul.f32 %v1299_v47, %v1473_v49  ;;  %v1490_v10 = vmul.f32 %v1302_v48, %v1476_v29  ;;  %v1494_v1 = vmul.f32 %v1299_v47, %v1479_v41 }
 0x156   :  { %2303 = vst [vmem:[#allocation32_spill] sm:$0xff] %v1479_v41  ;;  %2304 = vst [vmem:[#allocation33_spill] sm:$0xff] %v1482_v42  ;;  %v1498_v28 = vmul.f32 %v1302_v48, %v1482_v42  ;;  %v1506_v49 = vrot.slane %v1288_v44, %v1225_v9  ;;  %v393_v56 = vpop.permute.xlu1 %392  ;;  %v389_v16 = vpop.permute.xlu0 %388  ;;  %v1526_v9 = vrot.slane %v1288_v44, %v1243_v18 }
 0x157   :  { %2305 = vst [vmem:[#allocation34_spill] sm:$0xff] %v1486_v13  ;;  %2306 = vst [vmem:[#allocation35_spill] sm:$0xff] %v1490_v10  ;;  %v1509_v29 = vsub.f32 %v393_v56, %v1292_v45  ;;  %v1512_v41 = vsub.f32 %v393_v56, %v1296_v46  ;;  %v1515_v10 = vsub.f32 %v389_v16, %v1292_v45 }
 0x158   :  { %2307 = vst [vmem:[#allocation36_spill] sm:$0xff] %v1494_v1  ;;  %2308 = vst [vmem:[#allocation37_spill] sm:$0xff] %v1498_v28  ;;  %v1518_v42 = vsub.f32 %v389_v16, %v1296_v46  ;;  %v1522_v13 = vrot.slane %v1283_v43, %v1243_v18 }
 0x159   :  { %2309 = vst [vmem:[#allocation38_spill] sm:$0xff] %v1509_v29  ;;  %2310 = vst [vmem:[#allocation39_spill] sm:$0xff] %v1512_v41  ;;  %v1530_v28 = vmul.f32 %v1299_v47, %v1509_v29  ;;  %v1534_v56 = vmul.f32 %v1302_v48, %v1512_v41  ;;  %v1538_v45 = vmul.f32 %v1299_v47, %v1515_v10 }
 0x15a   :  { %2311 = vst [vmem:[#allocation40_spill] sm:$0xff] %v1515_v10  ;;  %2312 = vst [vmem:[#allocation41_spill] sm:$0xff] %v1518_v42  ;;  %v1542_v43 = vmul.f32 %v1302_v48, %v1518_v42  ;;  %v215_v46 = vpop.permute.xlu1 %214  ;;  %v204_v16 = vpop.permute.xlu0 %203 }
 0x15b   :  { %2313 = vst [vmem:[#allocation42_spill] sm:$0xff] %v1530_v28  ;;  %v292_v18 = vsub.f32 %v215_v46, %v1502_v6  ;;  %v732_v44 = vsub.f32 %v215_v46, %v1506_v49  ;;  %v290_v29 = vsub.f32 %v204_v16, %v1502_v6  ;;  %v730_v28 = vsub.f32 %v204_v16, %v1506_v49 }
 0x15c   :  { %v430_v46 = vmul.f32 %v1311_v53, %v1311_v53 }
 0x15d   :  { %v1549_v41 = vmul.f32 %v1522_v13, %v292_v18  ;;  %v1552_v47 = vmul.f32 %v1526_v9, %v732_v44  ;;  %v1555_v10 = vmul.f32 %v1522_v13, %v290_v29  ;;  %v1558_v48 = vmul.f32 %v1526_v9, %v730_v28 }
 0x15e   :  { %v219_v42 = vpop.permute.xlu1 %218  ;;  %v208_v27 = vpop.permute.xlu0 %207  ;;  %v414_v1 = vmul.f32 %v290_v29, %v290_v29  ;;  %v416_v38 = vmul.f32 %v292_v18, %v292_v18  ;;  %v432_v18 = vmul.f32 %v1339_v63, %v1339_v63 }
 0x15f   :  { %v293_v16 = vsub.f32 %v219_v42, %v1502_v6  ;;  %v733_v17 = vsub.f32 %v219_v42, %v1506_v49  ;;  %v291_v8 = vsub.f32 %v208_v27, %v1502_v6  ;;  %v731_v39 = vsub.f32 %v208_v27, %v1506_v49 }
 0x160   :  { %v1566_v40 = vadd.f32 %v430_v46, %v414_v1  ;;  %v431_v1 = vmul.f32 %v1305_v51, %v1305_v51  ;;  %v1595_v30 = vadd.f32 %v432_v18, %v416_v38 }
 0x161   :  { %v1569_v55 = vmul.f32 %v1522_v13, %v293_v16  ;;  %v1572_v33 = vmul.f32 %v1526_v9, %v733_v17  ;;  %v1575_v29 = vmul.f32 %v1522_v13, %v291_v8  ;;  %v1578_v53 = vmul.f32 %v1526_v9, %v731_v39 }
 0x162   :  { %2314 = vst [vmem:[#allocation43_spill] sm:$0xff] %v1566_v40  ;;  %462 = vmin.xlane.f32.xlu0 %v1566_v40  ;;  %v230_v42 = vpop.permute.xlu1 %229  ;;  %v226_v50 = vpop.permute.xlu0 %225  ;;  %v415_v27 = vmul.f32 %v291_v8, %v291_v8  ;;  %2316 = vst [vmem:[#allocation45_spill] sm:$0xff] %v1595_v30  ;;  %v766_v8 = vmul.f32 %v730_v28, %v730_v28  ;;  %v417_v21 = vmul.f32 %v293_v16, %v293_v16 }
 0x163   :  { %v1586_v46 = vsub.f32 %v230_v42, %v1502_v6  ;;  %v1589_v32 = vsub.f32 %v230_v42, %v1506_v49  ;;  %v294_v31 = vsub.f32 %v226_v50, %v1502_v6  ;;  %v734_v22 = vsub.f32 %v226_v50, %v1506_v49 }
 0x164   :  { %v1593_v40 = vadd.f32 %v431_v1, %v415_v27  ;;  %v782_v28 = vmul.f32 %v1314_v54, %v1314_v54  ;;  %v433_v16 = vmul.f32 %v1333_v61, %v1333_v61  ;;  %v767_v54 = vmul.f32 %v731_v39, %v731_v39 }
 0x165   :  { %v1599_v51 = vmul.f32 %v1522_v13, %v1586_v46  ;;  %v1603_v63 = vmul.f32 %v1526_v9, %v1589_v32  ;;  %v1606_v42 = vmul.f32 %v1522_v13, %v294_v31  ;;  %v1609_v20 = vmul.f32 %v1526_v9, %v734_v22 }
 0x166   :  { %2315 = vst [vmem:[#allocation44_spill] sm:$0xff] %v1593_v40  ;;  %464 = vmin.xlane.f32.xlu1 %v1593_v40  ;;  %466 = vmin.xlane.f32.xlu0 %v1595_v30  ;;  %v241_v38 = vpop.permute.xlu1 %240  ;;  %v237_v50 = vpop.permute.xlu0 %236  ;;  %v1627_v30 = vadd.f32 %v782_v28, %v766_v8  ;;  %v783_v8 = vmul.f32 %v1308_v52, %v1308_v52 }
 0x167   :  { %2317 = vst [vmem:[#allocation46_spill] sm:$0xff] %v1599_v51  ;;  %2318 = vst [vmem:[#allocation47_spill] sm:$0xff] %v1603_v63  ;;  %v1618_v27 = vsub.f32 %v241_v38, %v1502_v6  ;;  %v1621_v1 = vsub.f32 %v241_v38, %v1506_v49  ;;  %v296_v18 = vsub.f32 %v237_v50, %v1502_v6 }
 0x168   :  { %2319 = vst [vmem:[#allocation48_spill] sm:$0xff] %v1609_v20  ;;  %v1625_v40 = vsub.f32 %v237_v50, %v1506_v49  ;;  %2320 = vst [vmem:[#allocation49_spill] sm:$0xff] %v1627_v30  ;;  %v1629_v63 = vadd.f32 %v433_v16, %v417_v21  ;;  %v768_v51 = vmul.f32 %v732_v44, %v732_v44 }
 0x169   :  { %v1633_v61 = vmul.f32 %v1522_v13, %v1618_v27  ;;  %v1637_v20 = vmul.f32 %v1526_v9, %v1621_v1  ;;  %v1640_v38 = vmul.f32 %v1522_v13, %v296_v18  ;;  %v784_v44 = vmul.f32 %v1342_v0, %v1342_v0 }
 0x16a   :  { %2321 = vst [vmem:[#allocation50_spill] sm:$0xff] %v1629_v63  ;;  %v1644_v50 = vmul.f32 %v1526_v9, %v1625_v40  ;;  %814 = vmin.xlane.f32.xlu1 %v1627_v30  ;;  %468 = vmin.xlane.f32.xlu0 %v1629_v63  ;;  %v252_v21 = vpop.permute.xlu1 %251  ;;  %v248_v39 = vpop.permute.xlu0 %247  ;;  %v785_v28 = vmul.f32 %v1336_v62, %v1336_v62 }
 0x16b   :  { %2322 = vst [vmem:[#allocation51_spill] sm:$0xff] %v1633_v61  ;;  %2323 = vst [vmem:[#allocation52_spill] sm:$0xff] %v1637_v20  ;;  %v1655_v16 = vsub.f32 %v252_v21, %v1502_v6  ;;  %v1658_v20 = vsub.f32 %v252_v21, %v1506_v49  ;;  %v298_v30 = vsub.f32 %v248_v39, %v1502_v6 }
 0x16c   :  { %2324 = vst [vmem:[#allocation53_spill] sm:$0xff] %v1640_v38  ;;  %2325 = vst [vmem:[#allocation54_spill] sm:$0xff] %v1644_v50  ;;  %v1662_v63 = vsub.f32 %v248_v39, %v1506_v49  ;;  %v1664_v61 = vadd.f32 %v784_v44, %v768_v51  ;;  %v1666_v0 = vadd.f32 %v783_v8, %v767_v54 }
 0x16d   :  { %v418_v50 = vmul.f32 %v294_v31, %v294_v31  ;;  %v769_v52 = vmul.f32 %v733_v17, %v733_v17  ;;  %v1670_v62 = vmul.f32 %v1522_v13, %v1655_v16  ;;  %v1674_v38 = vmul.f32 %v1526_v9, %v1658_v20 }
 0x16e   :  { %2326 = vst [vmem:[#allocation55_spill] sm:$0xff] %v1664_v61  ;;  %2327 = vst [vmem:[#allocation56_spill] sm:$0xff] %v1666_v0  ;;  %v1677_v21 = vmul.f32 %v1522_v13, %v298_v30  ;;  %v1681_v39 = vmul.f32 %v1526_v9, %v1662_v63  ;;  %818 = vmin.xlane.f32.xlu1 %v1664_v61  ;;  %816 = vmin.xlane.f32.xlu0 %v1666_v0  ;;  %v263_v31 = vpop.permute.xlu1 %262  ;;  %v259_v17 = vpop.permute.xlu0 %258 }
 0x16f   :  { %2328 = vst [vmem:[#allocation57_spill] sm:$0xff] %v1670_v62  ;;  %2329 = vst [vmem:[#allocation58_spill] sm:$0xff] %v1674_v38  ;;  %v434_v51 = vmul.f32 %v1367_v14, %v1367_v14  ;;  %v786_v54 = vmul.f32 %v1370_v15, %v1370_v15  ;;  %v435_v44 = vmul.f32 %v1361_v11, %v1361_v11 }
 0x170   :  { %2330 = vst [vmem:[#allocation59_spill] sm:$0xff] %v1681_v39  ;;  %v1692_v8 = vsub.f32 %v263_v31, %v1502_v6  ;;  %v1695_v38 = vsub.f32 %v263_v31, %v1506_v49  ;;  %v1698_v61 = vsub.f32 %v259_v17, %v1502_v6  ;;  %v1701_v0 = vsub.f32 %v259_v17, %v1506_v49 }
 0x171   :  { %v1703_v62 = vadd.f32 %v434_v51, %v418_v50  ;;  %v1705_v14 = vadd.f32 %v785_v28, %v769_v52  ;;  %v770_v15 = vmul.f32 %v734_v22, %v734_v22  ;;  %v419_v11 = vmul.f32 %v1586_v46, %v1586_v46 }
 0x172   :  { %2331 = vst [vmem:[#allocation60_spill] sm:$0xff] %v1692_v8  ;;  %2332 = vst [vmem:[#allocation61_spill] sm:$0xff] %v1695_v38  ;;  %v1711_v39 = vmul.f32 %v1522_v13, %v1692_v8  ;;  %v1715_v31 = vmul.f32 %v1526_v9, %v1695_v38  ;;  %v1719_v17 = vmul.f32 %v1522_v13, %v1698_v61  ;;  %v274_v22 = vpop.permute.xlu1 %273  ;;  %v270_v46 = vpop.permute.xlu0 %269 }
 0x173   :  { %2333 = vst [vmem:[#allocation62_spill] sm:$0xff] %v1701_v0  ;;  %2334 = vst [vmem:[#allocation63_spill] sm:$0xff] %v1703_v62  ;;  %v1723_v50 = vmul.f32 %v1526_v9, %v1701_v0  ;;  %470 = vmin.xlane.f32.xlu1 %v1703_v62  ;;  %820 = vmin.xlane.f32.xlu0 %v1705_v14  ;;  %v436_v28 = vmul.f32 %v1395_v25, %v1395_v25 }
 0x174   :  { %2335 = vst [vmem:[#allocation64_spill] sm:$0xff] %v1705_v14  ;;  %2336 = vst [vmem:[#allocation65_spill] sm:$0xff] %v1715_v31  ;;  %v771_v52 = vmul.f32 %v1589_v32, %v1589_v32  ;;  %v787_v51 = vmul.f32 %v1364_v12, %v1364_v12  ;;  %v1734_v38 = vsub.f32 %v274_v22, %v1502_v6 }
 0x175   :  { %v1737_v8 = vsub.f32 %v274_v22, %v1506_v49  ;;  %v1740_v62 = vsub.f32 %v270_v46, %v1502_v6  ;;  %v1743_v14 = vsub.f32 %v270_v46, %v1506_v49  ;;  %v1745_v0 = vadd.f32 %v786_v54, %v770_v15 }
 0x176   :  { %2337 = vst [vmem:[#allocation66_spill] sm:$0xff] %v1734_v38  ;;  %v1747_v25 = vadd.f32 %v435_v44, %v419_v11  ;;  %v420_v32 = vmul.f32 %v296_v18, %v296_v18  ;;  %v788_v12 = vmul.f32 %v1398_v26, %v1398_v26  ;;  %v1753_v31 = vmul.f32 %v1522_v13, %v1734_v38  ;;  %v285_v26 = vpop.permute.xlu1 %284  ;;  %v281_v18 = vpop.permute.xlu0 %280 }
 0x177   :  { %2338 = vst [vmem:[#allocation67_spill] sm:$0xff] %v1737_v8  ;;  %2339 = vst [vmem:[#allocation68_spill] sm:$0xff] %v1743_v14  ;;  %v1757_v22 = vmul.f32 %v1526_v9, %v1737_v8  ;;  %v1761_v46 = vmul.f32 %v1522_v13, %v1740_v62  ;;  %v1765_v54 = vmul.f32 %v1526_v9, %v1743_v14  ;;  %822 = vmin.xlane.f32.xlu1 %v1745_v0 }
 0x178   :  { %2340 = vst [vmem:[#allocation69_spill] sm:$0xff] %v1745_v0  ;;  %2341 = vst [vmem:[#allocation70_spill] sm:$0xff] %v1747_v25  ;;  %472 = vmin.xlane.f32.xlu0 %v1747_v25  ;;  %v1769_v44 = vadd.f32 %v787_v51, %v771_v52  ;;  %v772_v15 = vmul.f32 %v1625_v40, %v1625_v40  ;;  %v437_v11 = vmul.f32 %v1389_v23, %v1389_v23 }
 0x179   :  { %v1776_v8 = vsub.f32 %v285_v26, %v1502_v6  ;;  %v1779_v38 = vsub.f32 %v285_v26, %v1506_v49  ;;  %v1782_v0 = vsub.f32 %v281_v18, %v1502_v6  ;;  %v1785_v25 = vsub.f32 %v281_v18, %v1506_v49 }
 0x17a   :  { %2342 = vst [vmem:[#allocation71_spill] sm:$0xff] %v1769_v44  ;;  %v1787_v52 = vadd.f32 %v436_v28, %v420_v32  ;;  %v421_v40 = vmul.f32 %v1618_v27, %v1618_v27  ;;  %v422_v51 = vmul.f32 %v298_v30, %v298_v30  ;;  %v773_v23 = vmul.f32 %v1621_v1, %v1621_v1 }
 0x17b   :  { %v513_v14 = vmul.f32 %v1522_v13, %v1776_v8  ;;  %v865_v26 = vmul.f32 %v1526_v9, %v1779_v38  ;;  %v512_v6 = vmul.f32 %v1522_v13, %v1782_v0  ;;  %v864_v49 = vmul.f32 %v1526_v9, %v1785_v25 }
 0x17c   :  { %474 = vmin.xlane.f32.xlu1 %v1787_v52  ;;  %824 = vmin.xlane.f32.xlu0 %v1769_v44  ;;  %v789_v30 = vmul.f32 %v1392_v24, %v1392_v24  ;;  %v774_v27 = vmul.f32 %v1662_v63, %v1662_v63  ;;  %v423_v1 = vmul.f32 %v1655_v16, %v1655_v16 }
 0x17d   :  { %v438_v28 = vmul.f32 %v1423_v36, %v1423_v36  ;;  %v790_v13 = vmul.f32 %v1426_v37, %v1426_v37  ;;  %v439_v9 = vmul.f32 %v1417_v34, %v1417_v34  ;;  %v791_v32 = vmul.f32 %v1420_v35, %v1420_v35 }
 0x17e   :  { %v1817_v18 = vadd.f32 %v788_v12, %v772_v15  ;;  %v1819_v24 = vadd.f32 %v437_v11, %v421_v40  ;;  %v440_v63 = vmul.f32 %v1451_v2, %v1451_v2  ;;  %v1824_v16 = vadd.f32 %v1538_v45, %v512_v6  ;;  %v2354_v40 = vld [vmem:[#allocation51_spill] sm:$0xff] }
 0x17f   :  { %v1826_v36 = vadd.f32 %v438_v28, %v422_v51  ;;  %v1828_v44 = vadd.f32 %v789_v30, %v773_v23  ;;  %v775_v34 = vmul.f32 %v1658_v20, %v1658_v20  ;;  %v1833_v37 = vadd.f32 %v1542_v43, %v864_v49  ;;  %v2355_v51 = vld [vmem:[#allocation17_spill] sm:$0xff]  ;;  %v2357_v49 = vld [vmem:[#allocation52_spill] sm:$0xff]  ;;  %v2358_v30 = vld [vmem:[#allocation18_spill] sm:$0xff] }
 0x180   :  { %826 = vmin.xlane.f32.xlu1 %v1817_v18  ;;  %476 = vmin.xlane.f32.xlu0 %v1819_v24  ;;  %v1837_v35 = vadd.f32 %v790_v13, %v774_v27  ;;  %v1839_v2 = vadd.f32 %v439_v9, %v423_v1  ;;  %v424_v45 = vmul.f32 %v1698_v61, %v1698_v61  ;;  %v2359_v1 = vld [vmem:[#allocation59_spill] sm:$0xff]  ;;  %v2360_v28 = vld [vmem:[#allocation22_spill] sm:$0xff]  ;;  %v2361_v9 = vld [vmem:[#allocation57_spill] sm:$0xff] }
 0x181   :  { %v1844_v12 = vadd.f32 %v1534_v56, %v865_v26  ;;  %v1848_v20 = vadd.f32 %v1318_v57, %v1575_v29  ;;  %v1852_v43 = vadd.f32 %v1346_v3, %v1549_v41  ;;  %v1856_v15 = vadd.f32 %v1322_v58, %v1555_v10  ;;  %v2345_v3 = vld [vmem:[#allocation12_spill] sm:$0xff]  ;;  %v2350_v29 = vld [vmem:[#allocation47_spill] sm:$0xff]  ;;  %v2356_v26 = vld [vmem:[#allocation21_spill] sm:$0xff] }
 0x182   :  { %v1860_v11 = vadd.f32 %v1326_v59, %v1558_v48  ;;  %v1864_v56 = vadd.f32 %v1350_v4, %v1569_v55  ;;  %v1868_v57 = vadd.f32 %v1354_v5, %v1552_v47  ;;  %v1872_v41 = vadd.f32 %v1330_v60, %v1578_v53  ;;  %v2344_v59 = vld [vmem:[#allocation48_spill] sm:$0xff]  ;;  %v2346_v55 = vld [vmem:[#allocation46_spill] sm:$0xff]  ;;  %v2347_v48 = vld [vmem:[#allocation13_spill] sm:$0xff] }
 0x183   :  { %2343 = vst [vmem:[#allocation72_spill] sm:$0xff] %v1844_v12  ;;  %v1876_v10 = vadd.f32 %v1374_v19, %v1606_v42  ;;  %v1880_v58 = vadd.f32 %v1358_v7, %v1572_v33  ;;  %v1884_v4 = vadd.f32 %v2345_v3, %v2344_v59  ;;  %v1888_v5 = vadd.f32 %v2347_v48, %v2346_v55  ;;  %v2348_v60 = vld [vmem:[#allocation53_spill] sm:$0xff]  ;;  %v2349_v47 = vld [vmem:[#allocation15_spill] sm:$0xff]  ;;  %v2351_v53 = vld [vmem:[#allocation14_spill] sm:$0xff] }
 0x184   :  { %478 = vmin.xlane.f32.xlu1 %v1826_v36  ;;  %828 = vmin.xlane.f32.xlu0 %v1828_v44  ;;  %v1894_v19 = vadd.f32 %v2349_v47, %v2348_v60  ;;  %v1898_v7 = vadd.f32 %v2351_v53, %v2350_v29  ;;  %v2352_v33 = vld [vmem:[#allocation54_spill] sm:$0xff]  ;;  %v2353_v42 = vld [vmem:[#allocation16_spill] sm:$0xff]  ;;  %v1906_v23 = vadd.f32 %v2355_v51, %v2354_v40  ;;  %v2362_v59 = vld [vmem:[#allocation19_spill] sm:$0xff] }
 0x185   :  { %v1902_v61 = vadd.f32 %v2353_v42, %v2352_v33  ;;  %v1910_v6 = vadd.f32 %v2356_v26, %v1677_v21  ;;  %v1914_v27 = vadd.f32 %v2358_v30, %v2357_v49  ;;  %v1918_v13 = vadd.f32 %v2360_v28, %v2359_v1  ;;  %v2363_v55 = vld [vmem:[#allocation28_spill] sm:$0xff]  ;;  %v2364_v60 = vld [vmem:[#allocation58_spill] sm:$0xff]  ;;  %v2366_v29 = vld [vmem:[#allocation29_spill] sm:$0xff] }
 0x186   :  { %v1922_v3 = vadd.f32 %v2362_v59, %v2361_v9  ;;  %v1926_v48 = vadd.f32 %v2363_v55, %v1719_v17  ;;  %v2365_v47 = vld [vmem:[#allocation20_spill] sm:$0xff]  ;;  %v1934_v53 = vadd.f32 %v2366_v29, %v1723_v50  ;;  %v2367_v33 = vld [vmem:[#allocation26_spill] sm:$0xff]  ;;  %v2369_v26 = vld [vmem:[#allocation65_spill] sm:$0xff]  ;;  %v1965_v55 = vadd.f32 %v440_v63, %v424_v45 }
 0x187   :  { %v1930_v21 = vadd.f32 %v2365_v47, %v2364_v60  ;;  %v1938_v42 = vadd.f32 %v2367_v33, %v1711_v39  ;;  %v2368_v40 = vld [vmem:[#allocation36_spill] sm:$0xff]  ;;  %v2370_v49 = vld [vmem:[#allocation27_spill] sm:$0xff]  ;;  %v2371_v30 = vld [vmem:[#allocation37_spill] sm:$0xff]  ;;  %v1967_v60 = vadd.f32 %v791_v32, %v775_v34  ;;  %v426_v34 = vmul.f32 %v1740_v62, %v1740_v62 }
 0x188   :  { %v1942_v51 = vadd.f32 %v2368_v40, %v1761_v46  ;;  %v1946_v17 = vadd.f32 %v2370_v49, %v2369_v26  ;;  %v1950_v1 = vadd.f32 %v2371_v30, %v1765_v54  ;;  %830 = vmin.xlane.f32.xlu1 %v1837_v35  ;;  %480 = vmin.xlane.f32.xlu0 %v1839_v2  ;;  %v2372_v50 = vld [vmem:[#allocation34_spill] sm:$0xff]  ;;  %v2373_v28 = vld [vmem:[#allocation35_spill] sm:$0xff]  ;;  %v2376_v29 = vld [vmem:[#allocation60_spill] sm:$0xff] }
 0x189   :  { %v1956_v39 = vadd.f32 %v2372_v50, %v1753_v31  ;;  %v1960_v46 = vadd.f32 %v2373_v28, %v1757_v22  ;;  %v2374_v9 = vld [vmem:[#allocation42_spill] sm:$0xff]  ;;  %v425_v33 = vmul.f32 %v2376_v29, %v2376_v29  ;;  %v2377_v31 = vld [vmem:[#allocation25_spill] sm:$0xff]  ;;  %v2378_v40 = vld [vmem:[#allocation23_spill] sm:$0xff] }
 0x18a   :  { %v1963_v59 = vadd.f32 %v2374_v9, %v513_v14  ;;  %v2375_v54 = vld [vmem:[#allocation62_spill] sm:$0xff]  ;;  %v792_v22 = vmul.f32 %v2377_v31, %v2377_v31  ;;  %v441_v14 = vmul.f32 %v2378_v40, %v2378_v40  ;;  %v2379_v45 = vld [vmem:[#allocation61_spill] sm:$0xff]  ;;  %v2380_v49 = vld [vmem:[#allocation32_spill] sm:$0xff] }
 0x18b   :  { %v776_v47 = vmul.f32 %v2375_v54, %v2375_v54  ;;  %v777_v26 = vmul.f32 %v2379_v45, %v2379_v45  ;;  %v442_v30 = vmul.f32 %v2380_v49, %v2380_v49  ;;  %v2381_v50 = vld [vmem:[#allocation24_spill] sm:$0xff]  ;;  %v2383_v29 = vld [vmem:[#allocation66_spill] sm:$0xff]  ;;  %v2384_v31 = vld [vmem:[#allocation33_spill] sm:$0xff] }
 0x18c   :  { %482 = vmin.xlane.f32.xlu1 %v1965_v55  ;;  %832 = vmin.xlane.f32.xlu0 %v1967_v60  ;;  %v1981_v32 = vadd.f32 %v441_v14, %v425_v33  ;;  %v793_v28 = vmul.f32 %v2381_v50, %v2381_v50  ;;  %v427_v33 = vmul.f32 %v2383_v29, %v2383_v29  ;;  %v2385_v40 = vld [vmem:[#allocation30_spill] sm:$0xff]  ;;  %v2386_v49 = vld [vmem:[#allocation67_spill] sm:$0xff]  ;;  %v2387_v50 = vld [vmem:[#allocation40_spill] sm:$0xff] }
 0x18d   :  { %v1979_v63 = vadd.f32 %v792_v22, %v776_v47  ;;  %v1993_v9 = vadd.f32 %v442_v30, %v426_v34  ;;  %v2382_v47 = vld [vmem:[#allocation68_spill] sm:$0xff]  ;;  %v794_v22 = vmul.f32 %v2384_v31, %v2384_v31  ;;  %v443_v14 = vmul.f32 %v2385_v40, %v2385_v40 }
 0x18e   :  { %v1995_v54 = vadd.f32 %v793_v28, %v777_v26  ;;  %v778_v62 = vmul.f32 %v2382_v47, %v2382_v47  ;;  %v428_v26 = vmul.f32 %v1782_v0, %v1782_v0  ;;  %v779_v30 = vmul.f32 %v2386_v49, %v2386_v49  ;;  %v2388_v47 = vld [vmem:[#allocation31_spill] sm:$0xff] }
 0x18f   :  { %v2009_v45 = vadd.f32 %v443_v14, %v427_v33  ;;  %v444_v28 = vmul.f32 %v2387_v50, %v2387_v50  ;;  %v795_v29 = vmul.f32 %v2388_v47, %v2388_v47  ;;  %v780_v0 = vmul.f32 %v1785_v25, %v1785_v25  ;;  %v2390_v14 = vld [vmem:[#allocation38_spill] sm:$0xff]  ;;  %v132_v47 = vpop.permute.xlu1 %131 }
 0x190   :  { %834 = vmin.xlane.f32.xlu1 %v1979_v63  ;;  %484 = vmin.xlane.f32.xlu0 %v1981_v32  ;;  %v2007_v34 = vadd.f32 %v794_v22, %v778_v62  ;;  %v429_v31 = vmul.f32 %v1776_v8, %v1776_v8  ;;  %v2389_v22 = vld [vmem:[#allocation41_spill] sm:$0xff]  ;;  %v445_v49 = vmul.f32 %v2390_v14, %v2390_v14  ;;  %v2391_v8 = vld [vmem:[#allocation39_spill] sm:$0xff] }
 0x191   :  { %v2021_v62 = vadd.f32 %v444_v28, %v428_v26  ;;  %v2023_v33 = vadd.f32 %v795_v29, %v779_v30  ;;  %v796_v40 = vmul.f32 %v2389_v22, %v2389_v22  ;;  %v781_v30 = vmul.f32 %v1779_v38, %v1779_v38  ;;  %v127_v29 = vpop.permute.xlu0 %126  ;;  %v2393_v22 = vld [vmem:[#allocation7_spill] sm:$0xff] }
 0x192   :  { %v2035_v50 = vadd.f32 %v445_v49, %v429_v31  ;;  %v797_v25 = vmul.f32 %v2391_v8, %v2391_v8  ;;  %v134_v14 = vmul.f32 %v2393_v22, %v132_v47  ;;  %v2396_v49 = vld [vmem:[#allocation44_spill] sm:$0xff]  ;;  %v2398_v47 = vld [vmem:[#allocation55_spill] sm:$0xff] }
 0x193   :  { %v812_v26 = vadd.f32 %v796_v40, %v780_v0  ;;  %v2394_v0 = vld [vmem:[#allocation8_spill] sm:$0xff] }
 0x194   :  { %486 = vmin.xlane.f32.xlu1 %v1993_v9  ;;  %836 = vmin.xlane.f32.xlu0 %v1995_v54  ;;  %v2042_v28 = vadd.f32 %v797_v25, %v781_v30  ;;  %v129_v31 = vmul.f32 %v127_v29, %v2394_v0  ;;  %v2397_v25 = vld [vmem:[#allocation49_spill] sm:$0xff] }
 0x196   :  { %2392 = vst [vmem:[#allocation48_spill] sm:$0xff] %v2042_v28  ;;  %v2047_v40 = vadd.f32 %v134_v14, %v129_v31  ;;  %v2399_v31 = vld [vmem:[#allocation63_spill] sm:$0xff] }
 0x198   :  { %838 = vmin.xlane.f32.xlu1 %v2007_v34  ;;  %488 = vmin.xlane.f32.xlu0 %v2009_v45  ;;  %2395 = vst [vmem:[#allocation12_spill] sm:$0xff] %v2047_v40 }
 0x19c   :  { %490 = vmin.xlane.f32.xlu1 %v2021_v62  ;;  %840 = vmin.xlane.f32.xlu0 %v2023_v33 }
 0x1a0   :  { %842 = vmin.xlane.f32.xlu1 %v812_v26  ;;  %492 = vmin.xlane.f32.xlu0 %v2035_v50 }
 0x1a4   :  { %844 = vmin.xlane.f32.xlu0 %v2042_v28 }
 0x1b1   :  { %169 = vrot.lane.b32.xlu1 %v2047_v40, %s1178_s2 }
 0x1ef   :  { %v465_v38 = vpop.xlane.xlu1 %464 }
 0x1f0   :  { %vm551_vm2 = vcmp.eq.f32.partialorder %v2396_v49, %v465_v38  ;;  %v2400_v38 = vld [vmem:[#allocation69_spill] sm:$0xff] }
 0x1f1   :  { %v567_v30 = vsel %vm551_vm2, %v1848_v20, -inf }
 0x1f3   :  { %v815_v8 = vpop.xlane.xlu1 %814 }
 0x1f4   :  { %vm902_vm3 = vcmp.eq.f32.partialorder %v2397_v25, %v815_v8  ;;  %v2401_v25 = vld [vmem:[#allocation11_spill] sm:$0xff] }
 0x1f5   :  { %v918_v12 = vsel %vm902_vm3, %v1860_v11, -inf }
 0x1f7   :  { %v819_v28 = vpop.xlane.xlu1 %818 }
 0x1f8   :  { %vm904_vm4 = vcmp.eq.f32.partialorder %v2398_v47, %v819_v28 }
 0x1f9   :  { %v920_v29 = vsel %vm904_vm4, %v1868_v57, -inf }
 0x1fc   :  { %v471_v14 = vpop.xlane.xlu1 %470 }
 0x1fd   :  { %vm554_vm5 = vcmp.eq.f32.partialorder %v2399_v31, %v471_v14  ;;  %v2402_v14 = vld [vmem:[#allocation10_spill] sm:$0xff] }
 0x1fe   :  { %v2059_v40 = vsel %vm554_vm5, %v1876_v10, -inf }
 0x200   :  { %v823_v0 = vpop.xlane.xlu1 %822 }
 0x201   :  { %vm906_vm6 = vcmp.eq.f32.partialorder %v2400_v38, %v823_v0 }
 0x202   :  { %v2063_v20 = vsel %vm906_vm6, %v1884_v4, -inf }
 0x205   :  { %v475_v49 = vpop.xlane.xlu1 %474 }
 0x206   :  { %vm556_vm7 = vcmp.eq.f32.partialorder %v1787_v52, %v475_v49 }
 0x207   :  { %v2067_v11 = vsel %vm556_vm7, %v1894_v19, -inf }
 0x209   :  { %v827_v28 = vpop.xlane.xlu1 %826 }
 0x20a   :  { %vm908_vm8 = vcmp.eq.f32.partialorder %v1817_v18, %v827_v28  ;;  %v2403_v28 = vld [vmem:[#allocation45_spill] sm:$0xff] }
 0x20b   :  { %v2071_v57 = vsel %vm908_vm8, %v1902_v61, -inf }
 0x20d   :  { %v479_v10 = vpop.xlane.xlu1 %478 }
 0x20e   :  { %vm558_vm9 = vcmp.eq.f32.partialorder %v1826_v36, %v479_v10 }
 0x20f   :  { %v2075_v0 = vsel %vm558_vm9, %v1910_v6, -inf }
 0x211   :  { %v831_v4 = vpop.xlane.xlu1 %830 }
 0x212   :  { %vm910_vm10 = vcmp.eq.f32.partialorder %v1837_v35, %v831_v4 }
 0x213   :  { %v2079_v52 = vsel %vm910_vm10, %v1918_v13, -inf }
 0x215   :  { %v483_v19 = vpop.xlane.xlu1 %482 }
 0x216   :  { %vm560_vm11 = vcmp.eq.f32.partialorder %v1965_v55, %v483_v19  ;;  %v2405_v19 = vld [vmem:[#allocation50_spill] sm:$0xff] }
 0x217   :  { %v2083_v18 = vsel %vm560_vm11, %v1926_v48, -inf }
 0x219   :  { %v835_v61 = vpop.xlane.xlu1 %834 }
 0x21a   :  { %vm912_vm12 = vcmp.eq.f32.partialorder %v1979_v63, %v835_v61 }
 0x21b   :  { %v2087_v36 = vsel %vm912_vm12, %v1934_v53, -inf  ;;  %v463_v53 = vpop.xlane.xlu0 %462 }
 0x21d   :  { %v487_v6 = vpop.xlane.xlu1 %486 }
 0x21e   :  { %vm562_vm13 = vcmp.eq.f32.partialorder %v1993_v9, %v487_v6  ;;  %v2406_v6 = vld [vmem:[#allocation56_spill] sm:$0xff] }
 0x21f   :  { %v2091_v35 = vsel %vm562_vm13, %v1942_v51, -inf  ;;  %v467_v31 = vpop.xlane.xlu0 %466 }
 0x220   :  { %vm552_vm2 = vcmp.eq.f32.partialorder %v2403_v28, %v467_v31 }
 0x221   :  { %v839_v13 = vpop.xlane.xlu1 %838 }
 0x222   :  { %vm914_vm14 = vcmp.eq.f32.partialorder %v2007_v34, %v839_v13 }
 0x223   :  { %v2095_v55 = vsel %vm914_vm14, %v1950_v1, -inf  ;;  %v469_v1 = vpop.xlane.xlu0 %468 }
 0x224   :  { %vm553_vm4 = vcmp.eq.f32.partialorder %v2405_v19, %v469_v1 }
 0x225   :  { %v491_v48 = vpop.xlane.xlu1 %490  ;;  %v569_v61 = vsel %vm553_vm4, %v1864_v56, -inf  ;;  %v2409_v56 = vld [vmem:[#allocation71_spill] sm:$0xff]  ;;  %vm641_vm4 = vcmask 130112  }
 0x226   :  { %vm564_vm15 = vcmp.eq.f32.partialorder %v2021_v62, %v491_v48  ;;  %v2407_v48 = vld [vmem:[#allocation64_spill] sm:$0xff] }
 0x227   :  { %v2099_v63 = vsel %vm564_vm15, %v1824_v16, -inf  ;;  %v817_v62 = vpop.xlane.xlu0 %816 }
 0x228   :  { %vm903_vm5 = vcmp.eq.f32.partialorder %v2406_v6, %v817_v62 }
 0x229   :  { %v843_v8 = vpop.xlane.xlu1 %842 }
 0x22a   :  { %vm916_vm0 = vcmp.eq.f32.partialorder %v812_v26, %v843_v8  ;;  %v568_v26 = vsel %vm552_vm2, %v1852_v43, -inf }
 0x22b   :  { %v2102_v9 = vsel %vm916_vm0, %v1833_v37, -inf  ;;  %v821_v16 = vpop.xlane.xlu0 %820  ;;  %v2404_v37 = vld [vmem:[#allocation43_spill] sm:$0xff] }
 0x22c   :  { %vm550_vm3 = vcmp.eq.f32.partialorder %v2404_v37, %v463_v53  ;;  %vm905_vm6 = vcmp.eq.f32.partialorder %v2407_v48, %v821_v16  ;;  %v2408_v53 = vld [vmem:[#allocation70_spill] sm:$0xff] }
 0x22d   :  { %v170_v51 = vpop.permute.xlu1 %169  ;;  %v566_v4 = vsel %vm550_vm3, %v1856_v15, -inf  ;;  %v921_v15 = vsel %vm905_vm6, %v1880_v58, -inf  ;;  %v2413_v37 = vld [vmem:[#allocation6_spill] sm:$0xff]  ;;  %vm708_vm6 = vcmask 1042434  }
 0x22e   :  { %v172_v47 = vmul.f32 %v170_v51, %v2401_v25  ;;  %v178_v34 = vmul.f32 %v170_v51, %v2402_v14 }
 0x22f   :  { %v473_v38 = vpop.xlane.xlu0 %472 }
 0x230   :  { %180 = vrot.lane.b32.xlu1 %v178_v34, %s1177_s1  ;;  %174 = vrot.lane.b32.xlu0 %v172_v47, %s1177_s1  ;;  %vm555_vm7 = vcmp.eq.f32.partialorder %v2408_v53, %v473_v38 }
 0x233   :  { %v825_v49 = vpop.xlane.xlu0 %824 }
 0x234   :  { %vm907_vm8 = vcmp.eq.f32.partialorder %v2409_v56, %v825_v49 }
 0x237   :  { %v477_v10 = vpop.xlane.xlu0 %476 }
 0x238   :  { %vm557_vm9 = vcmp.eq.f32.partialorder %v1819_v24, %v477_v10  ;;  %v2414_v10 = vld [vmem:[#allocation5_spill] sm:$0xff] }
 0x239   :  { %v573_v58 = vsel %vm557_vm9, %v1906_v23, -inf  ;;  %vm714_vm9 = vcmask 1045509  }
 0x23b   :  { %v829_v13 = vpop.xlane.xlu0 %828 }
 0x23c   :  { %vm909_vm10 = vcmp.eq.f32.partialorder %v1828_v44, %v829_v13 }
 0x23f   :  { %v481_v43 = vpop.xlane.xlu0 %480 }
 0x240   :  { %vm559_vm11 = vcmp.eq.f32.partialorder %v1839_v2, %v481_v43 }
 0x241   :  { %v575_v24 = vsel %vm559_vm11, %v1922_v3, -inf  ;;  %vm119_vm11 = vcmask 130048  }
 0x24f   :  { %584 = vmax.xlane.f32.xlu0 %v567_v30  ;;  %v919_v30 = vsel %vm903_vm5, %v1872_v41, -inf  ;;  %v923_v41 = vsel %vm907_vm8, %v1898_v7, -inf  ;;  %vm706_vm5 = vcmask 1041409   ;;  %vm712_vm8 = vcmask 1044484  }
 0x253   :  { %586 = vmax.xlane.f32.xlu0 %v568_v26 }
 0x254   :  { %582 = vmax.xlane.f32.xlu1 %v566_v4 }
 0x257   :  { %934 = vmax.xlane.f32.xlu0 %v918_v12  ;;  %v571_v12 = vsel %vm555_vm7, %v1888_v5, -inf  ;;  %v925_v5 = vsel %vm909_vm10, %v1914_v27, -inf  ;;  %vm710_vm7 = vcmask 1043459   ;;  %vm716_vm10 = vcmask 1046534  }
 0x258   :  { %588 = vmax.xlane.f32.xlu1 %v569_v61 }
 0x25b   :  { %938 = vmax.xlane.f32.xlu0 %v920_v29  ;;  %v833_v29 = vpop.xlane.xlu0 %832 }
 0x25c   :  { %936 = vmax.xlane.f32.xlu1 %v919_v30  ;;  %vm911_vm12 = vcmp.eq.f32.partialorder %v1967_v60, %v833_v29  ;;  %v2410_v60 = vld [vmem:[#allocation9_spill] sm:$0xff] }
 0x25d   :  { %v927_v44 = vsel %vm911_vm12, %v1930_v21, -inf  ;;  %vm718_vm12 = vcmask 1047559  }
 0x25f   :  { %590 = vmax.xlane.f32.xlu0 %v2059_v40  ;;  %v485_v40 = vpop.xlane.xlu0 %484 }
 0x260   :  { %940 = vmax.xlane.f32.xlu1 %v921_v15  ;;  %vm561_vm13 = vcmp.eq.f32.partialorder %v1981_v32, %v485_v40  ;;  %v1129_v32 = vadd.f32 -20.0, %v2410_v60 }
 0x261   :  { %v577_v2 = vsel %vm561_vm13, %v1938_v42, -inf }
 0x263   :  { %942 = vmax.xlane.f32.xlu0 %v2063_v20  ;;  %v837_v20 = vpop.xlane.xlu0 %836 }
 0x264   :  { %592 = vmax.xlane.f32.xlu1 %v571_v12  ;;  %vm913_vm14 = vcmp.eq.f32.partialorder %v1995_v54, %v837_v20  ;;  %v140_v54 = vmax.f32 %v1129_v32, 0.0 }
 0x265   :  { %v929_v27 = vsel %vm913_vm14, %v1946_v17, -inf  ;;  %vm164_vm14 = vcmask 392448  }
 0x267   :  { %594 = vmax.xlane.f32.xlu0 %v2067_v11  ;;  %v489_v7 = vpop.xlane.xlu0 %488  ;;  %v1130_v11 = vadd.f32 -40.0, %v2410_v60 }
 0x268   :  { %944 = vmax.xlane.f32.xlu1 %v923_v41  ;;  %vm563_vm15 = vcmp.eq.f32.partialorder %v2009_v45, %v489_v7  ;;  %v136_v45 = vmin.f32 %v2410_v60, 20.0 }
 0x269   :  { %v579_v21 = vsel %vm563_vm15, %v1956_v39, -inf }
 0x26b   :  { %946 = vmax.xlane.f32.xlu0 %v2071_v57  ;;  %v841_v23 = vpop.xlane.xlu0 %840  ;;  %v141_v57 = vmin.f32 %v140_v54, 20.0 }
 0x26c   :  { %596 = vmax.xlane.f32.xlu1 %v573_v58  ;;  %vm915_vm0 = vcmp.eq.f32.partialorder %v2023_v33, %v841_v23  ;;  %v2411_v33 = vld [vmem:[#allocation48_spill] sm:$0xff] }
 0x26d   :  { %v931_v42 = vsel %vm915_vm0, %v1960_v46, -inf  ;;  %v1131_v46 = vadd.f32 -60.0, %v2410_v60  ;;  %vm1108_vm0 = vcmask 1040384  }
 0x26f   :  { %598 = vmax.xlane.f32.xlu0 %v2075_v0  ;;  %v493_v3 = vpop.xlane.xlu0 %492  ;;  %v137_v0 = vmul.f32 0.15, %v136_v45 }
 0x270   :  { %948 = vmax.xlane.f32.xlu1 %v925_v5  ;;  %vm565_vm2 = vcmp.eq.f32.partialorder %v2035_v50, %v493_v3 }
 0x271   :  { %v581_v39 = vsel %vm565_vm2, %v1963_v59, -inf  ;;  %v1132_v59 = vadd.f32 -80.0, %v2410_v60  ;;  %vm1110_vm2 = vcmask 41984  }
 0x273   :  { %950 = vmax.xlane.f32.xlu0 %v2079_v52  ;;  %v845_v17 = vpop.xlane.xlu0 %844  ;;  %v145_v52 = vmax.f32 %v1130_v11, 0.0  ;;  %v155_v14 = vmax.f32 %v1132_v59, 0.0 }
 0x274   :  { %600 = vmax.xlane.f32.xlu1 %v575_v24  ;;  %vm917_vm3 = vcmp.eq.f32.partialorder %v2411_v33, %v845_v17 }
 0x275   :  { %v156_v31 = vmul.f32 0.2, %v155_v14 }
 0x277   :  { %602 = vmax.xlane.f32.xlu0 %v2083_v18  ;;  %v2412_v18 = vld [vmem:[#allocation72_spill] sm:$0xff] }
 0x278   :  { %952 = vmax.xlane.f32.xlu1 %v927_v44  ;;  %v933_v50 = vsel %vm917_vm3, %v2412_v18, -inf }
 0x27b   :  { %954 = vmax.xlane.f32.xlu0 %v2087_v36  ;;  %v142_v36 = vmul.f32 0.15, %v141_v57 }
 0x27c   :  { %604 = vmax.xlane.f32.xlu1 %v577_v2 }
 0x27f   :  { %606 = vmax.xlane.f32.xlu0 %v2091_v35  ;;  %v138_v35 = vadd.f32 -38.0, %v137_v0  ;;  %v2415_v0 = vld [vmem:[#allocation8_spill] sm:$0xff] }
 0x280   :  { %956 = vmax.xlane.f32.xlu1 %v929_v27 }
 0x281   :  { %v143_v8 = vadd.f32 %v142_v36, %v138_v35 }
 0x283   :  { %958 = vmax.xlane.f32.xlu0 %v2095_v55  ;;  %v146_v55 = vmin.f32 %v145_v52, 20.0 }
 0x284   :  { %608 = vmax.xlane.f32.xlu1 %v579_v21 }
 0x285   :  { %v147_v51 = vmul.f32 0.2, %v146_v55 }
 0x287   :  { %610 = vmax.xlane.f32.xlu0 %v2099_v63  ;;  %v150_v63 = vmax.f32 %v1131_v46, 0.0  ;;  %v148_v25 = vadd.f32 %v147_v51, %v143_v8 }
 0x288   :  { %960 = vmax.xlane.f32.xlu1 %v931_v42 }
 0x28b   :  { %962 = vmax.xlane.f32.xlu0 %v2102_v9  ;;  %v151_v9 = vmin.f32 %v150_v63, 20.0 }
 0x28c   :  { %612 = vmax.xlane.f32.xlu1 %v581_v39 }
 0x28d   :  { %v152_v47 = vmul.f32 0.2, %v151_v9 }
 0x28f   :  { %v153_v34 = vadd.f32 %v152_v47, %v148_v25 }
 0x290   :  { %964 = vmax.xlane.f32.xlu1 %v933_v50 }
 0x291   :  { %v157_v1 = vadd.f32 %v156_v31, %v153_v34 }
 0x2a1   :  { %116 = vrot.lane.b32.xlu0 %v2410_v60, %s1178_s2  ;;  %159 = vrot.lane.b32.xlu1 %v157_v1, %s1177_s1 }
 0x2a2   :  { %v175_v62 = vpop.permute.xlu0 %174  ;;  %v181_v38 = vpop.permute.xlu1 %180 }
 0x2a3   :  { %v183_v33 = vsub.f32 %v2393_v22, %v181_v38  ;;  %v177_v52 = vsub.f32 %v2415_v0, %v175_v62 }
 0x2a5   :  { %v185_v63 = vmul.f32 %v183_v33, %v183_v33  ;;  %v184_v8 = vmul.f32 %v177_v52, %v177_v52 }
 0x2a7   :  { %v186_v14 = vadd.f32 %v185_v63, %v184_v8  ;;  %v2416_v63 = vld [vmem:[#allocation12_spill] sm:$0xff] }
 0x2a9   :  { %1147 = vrsqrt.f32 %v186_v14  ;;  %vm189_vm13 = vcmp.eq.f32.partialorder %v186_v14, inf  ;;  %vm191_vm15 = vcmp.eq.f32.partialorder %v186_v14, 0.0 }
 0x2d8   :  { %v585_v16 = vpop.xlane.xlu0 %584 }
 0x2d9   :  { %v640_v26 = vrot.slane %v585_v16, %v2413_v37 }
 0x2dc   :  { %v587_v49 = vpop.xlane.xlu0 %586 }
 0x2dd   :  { %v583_v28 = vpop.xlane.xlu1 %582  ;;  %v646_v13 = vrot.slane %v587_v49, %v2414_v10 }
 0x2de   :  { %v635_v4 = vrot.slane %v583_v28, %v2414_v10 }
 0x2e0   :  { %v642_v19 = vsel %vm641_vm4, %v640_v26, %v635_v4  ;;  %v935_v61 = vpop.xlane.xlu0 %934 }
 0x2e1   :  { %v589_v6 = vpop.xlane.xlu1 %588  ;;  %v985_v12 = vrot.slane %v935_v61, %v2414_v10 }
 0x2e2   :  { %v650_v30 = vrot.slane %v589_v6, %v2413_v37 }
 0x2e4   :  { %v651_v48 = vsel %vm641_vm4, %v650_v30, %v646_v13  ;;  %v939_v43 = vpop.xlane.xlu0 %938 }
 0x2e5   :  { %v707_v15 = vsel %vm706_vm5, %v651_v48, %v642_v19  ;;  %v937_v53 = vpop.xlane.xlu1 %936  ;;  %v994_v58 = vrot.slane %v939_v43, %v2414_v10 }
 0x2e6   :  { %v989_v56 = vrot.slane %v937_v53, %v2413_v37 }
 0x2e8   :  { %v990_v29 = vsel %vm641_vm4, %v989_v56, %v985_v12  ;;  %v591_v41 = vpop.xlane.xlu0 %590 }
 0x2e9   :  { %v941_v40 = vpop.xlane.xlu1 %940  ;;  %v655_v2 = vrot.slane %v591_v41, %v2414_v10 }
 0x2ea   :  { %v998_v5 = vrot.slane %v941_v40, %v2413_v37 }
 0x2ec   :  { %v999_v20 = vsel %vm641_vm4, %v998_v5, %v994_v58  ;;  %v943_v24 = vpop.xlane.xlu0 %942  ;;  %v1148_v58 = vpop.eup %1147 }
 0x2ed   :  { %v1054_v7 = vsel %vm706_vm5, %v999_v20, %v990_v29  ;;  %v593_v44 = vpop.xlane.xlu1 %592  ;;  %v1003_v32 = vrot.slane %v943_v24, %v2414_v10 }
 0x2ee   :  { %v659_v23 = vrot.slane %v593_v44, %v2413_v37 }
 0x2f0   :  { %v660_v27 = vsel %vm641_vm4, %v659_v23, %v655_v2  ;;  %v595_v3 = vpop.xlane.xlu0 %594  ;;  %v188_v23 = vmul.f32 %v1148_v58, %v186_v14 }
 0x2f1   :  { %v709_v21 = vsel %vm708_vm6, %v660_v27, %v707_v15  ;;  %v945_v60 = vpop.xlane.xlu1 %944  ;;  %v664_v39 = vrot.slane %v595_v3, %v2414_v10 }
 0x2f2   :  { %v1007_v42 = vrot.slane %v945_v60, %v2413_v37 }
 0x2f4   :  { %v1008_v54 = vsel %vm641_vm4, %v1007_v42, %v1003_v32  ;;  %v947_v17 = vpop.xlane.xlu0 %946 }
 0x2f5   :  { %v1055_v45 = vsel %vm708_vm6, %v1008_v54, %v1054_v7  ;;  %v597_v11 = vpop.xlane.xlu1 %596  ;;  %v1012_v35 = vrot.slane %v947_v17, %v2414_v10  ;;  %v190_v54 = vsel %vm189_vm13, %v186_v14, %v188_v23 }
 0x2f6   :  { %v668_v57 = vrot.slane %v597_v11, %v2413_v37  ;;  %v192_v11 = vand.u32 2147483648, %v186_v14 }
 0x2f8   :  { %v669_v46 = vsel %vm641_vm4, %v668_v57, %v664_v39  ;;  %v599_v18 = vpop.xlane.xlu0 %598 }
 0x2f9   :  { %v711_v50 = vsel %vm710_vm7, %v669_v46, %v709_v21  ;;  %v949_v36 = vpop.xlane.xlu1 %948  ;;  %v673_v22 = vrot.slane %v599_v18, %v2414_v10  ;;  %v193_v18 = vsel %vm191_vm15, %v192_v11, %v190_v54 }
 0x2fa   :  { %v1016_v55 = vrot.slane %v949_v36, %v2413_v37 }
 0x2fc   :  { %v1017_v51 = vsel %vm641_vm4, %v1016_v55, %v1012_v35  ;;  %v951_v9 = vpop.xlane.xlu0 %950  ;;  %v194_v35 = vsel %vm164_vm14, %v193_v18, -inf }
 0x2fd   :  { %v1056_v59 = vsel %vm710_vm7, %v1017_v51, %v1055_v45  ;;  %v601_v25 = vpop.xlane.xlu1 %600  ;;  %v1021_v16 = vrot.slane %v951_v9, %v2414_v10 }
 0x2fe   :  { %v677_v47 = vrot.slane %v601_v25, %v2413_v37 }
 0x300   :  { %v678_v34 = vsel %vm641_vm4, %v677_v47, %v673_v22  ;;  %v603_v31 = vpop.xlane.xlu0 %602 }
 0x301   :  { %v713_v1 = vsel %vm712_vm8, %v678_v34, %v711_v50  ;;  %v953_v62 = vpop.xlane.xlu1 %952  ;;  %v682_v19 = vrot.slane %v603_v31, %v2414_v10 }
 0x302   :  { %v1025_v38 = vrot.slane %v953_v62, %v2413_v37 }
 0x304   :  { %v1026_v49 = vsel %vm641_vm4, %v1025_v38, %v1021_v16  ;;  %v955_v28 = vpop.xlane.xlu0 %954 }
 0x305   :  { %v1057_v26 = vsel %vm712_vm8, %v1026_v49, %v1056_v59  ;;  %v605_v4 = vpop.xlane.xlu1 %604  ;;  %v1030_v43 = vrot.slane %v955_v28, %v2414_v10 }
 0x306   :  { %v686_v61 = vrot.slane %v605_v4, %v2413_v37 }
 0x308   :  { %v687_v6 = vsel %vm641_vm4, %v686_v61, %v682_v19  ;;  %v607_v13 = vpop.xlane.xlu0 %606 }
 0x309   :  { %v957_v30 = vpop.xlane.xlu1 %956  ;;  %v715_v48 = vsel %vm714_vm9, %v687_v6, %v713_v1  ;;  %v691_v41 = vrot.slane %v607_v13, %v2414_v10 }
 0x30a   :  { %v1034_v15 = vrot.slane %v957_v30, %v2413_v37 }
 0x30c   :  { %v1035_v53 = vsel %vm641_vm4, %v1034_v15, %v1030_v43  ;;  %v959_v12 = vpop.xlane.xlu0 %958 }
 0x30d   :  { %v609_v56 = vpop.xlane.xlu1 %608  ;;  %v1058_v29 = vsel %vm714_vm9, %v1035_v53, %v1057_v26  ;;  %v1039_v44 = vrot.slane %v959_v12, %v2414_v10 }
 0x30e   :  { %v695_v40 = vrot.slane %v609_v56, %v2413_v37 }
 0x310   :  { %v696_v5 = vsel %vm641_vm4, %v695_v40, %v691_v41  ;;  %v611_v20 = vpop.xlane.xlu0 %610 }
 0x311   :  { %v961_v24 = vpop.xlane.xlu1 %960  ;;  %v717_v7 = vsel %vm716_vm10, %v696_v5, %v715_v48  ;;  %v700_v32 = vrot.slane %v611_v20, %v2414_v10 }
 0x312   :  { %v1043_v2 = vrot.slane %v961_v24, %v2413_v37 }
 0x314   :  { %v1044_v27 = vsel %vm641_vm4, %v1043_v2, %v1039_v44  ;;  %v963_v3 = vpop.xlane.xlu0 %962  ;;  %v1154_v2 = vld [vmem:[%s2231_s0 + $0x8] sm:$0xff] }
 0x315   :  { %v613_v21 = vpop.xlane.xlu1 %612  ;;  %v1059_v60 = vsel %vm716_vm10, %v1044_v27, %v1058_v29  ;;  %v1048_v0 = vrot.slane %v963_v3, %v2414_v10 }
 0x316   :  { %v704_v42 = vrot.slane %v613_v21, %v2413_v37 }
 0x318   :  { %v117_v17 = vpop.permute.xlu0 %116  ;;  %v705_v45 = vsel %vm641_vm4, %v704_v42, %v700_v32 }
 0x319   :  { %v120_v39 = vsel %vm119_vm11, %v117_v17, 0.0  ;;  %v965_v57 = vpop.xlane.xlu1 %964  ;;  %v719_v33 = vsel %vm718_vm12, %v705_v45, %v717_v7  ;;  %v1153_v7 = vld [vmem:[%s2231_s0] sm:$0xff]  ;;  %s1155_s0 = scalar_lea.vmem %s1119_s29, 32 }
 0x31a   :  { %v1052_v52 = vrot.slane %v965_v57, %v2413_v37  ;;  %121 = vadd.xlane.f32.xlu1 %v120_v39  ;;  %v721_v46 = vsel %vm119_vm11, %v719_v33, -inf  ;;  %p1156_p0 = scmp.ne.s32.totalorder %s1119_s29, %s1155_s0  ;;  %p1161_p2 = scmp.lt.s32.totalorder %s1155_s0, %s1155_s0 }
 0x31b   :  { %722 = vmax.xlane.f32.xlu0 %v721_v46 }
 0x31c   :  { %v1053_v50 = vsel %vm641_vm4, %v1052_v52, %v1048_v0  ;;  %p1162_p3 = por %p1161_p2, %p1160_p1 }
 0x31d   :  { %v160_v36 = vpop.permute.xlu1 %159  ;;  %v1060_v55 = vsel %vm718_vm12, %v1053_v50, %v1059_v60 }
 0x31e   :  { %v162_v8 = vsub.f32 %v2416_v63, %v160_v36  ;;  %195 = vmax.xlane.f32.xlu1 %v194_v35  ;;  %v1062_v51 = vsel %vm119_vm11, %v1060_v55, -inf  ;;  %p1163_p4 = pnand %p1162_p3, %p1156_p0 }
 0x31f   :  { %1063 = vmax.xlane.f32.xlu0 %v1062_v51 }
 0x320   :  { %v163_v10 = vmin.f32 %v162_v8, 0.0 }
 0x322   :  { %v165_v37 = vsel %vm164_vm14, %v163_v10, inf }
 0x323   :  { %166 = vmin.xlane.f32.xlu0 %v165_v37 }
 0x3a3   :  { %v122_v9 = vpop.xlane.xlu1 %121 }
 0x3a4   :  { %v723_v59 = vpop.xlane.xlu0 %722  ;;  %v124_v25 = vmul.f32 0.0625, %v122_v9 }
 0x3a5   :  { %v724_v14 = vmax.f32 %v723_v59, 0.0 }
 0x3a6   :  { %v1069_v1 = vmul.f32 0.1, %v124_v25 }
 0x3a7   :  { %v196_v22 = vpop.xlane.xlu1 %195 }
 0x3a8   :  { %v1064_v47 = vpop.xlane.xlu0 %1063  ;;  %v1133_v34 = vadd.f32 -19.6, %v196_v22 }
 0x3a9   :  { %v1065_v31 = vmax.f32 %v1064_v47, 0.0 }
 0x3aa   :  { %v1072_v38 = vmax.f32 %v1133_v34, 0.0 }
 0x3ab   :  { %v1066_v62 = vmax.f32 %v724_v14, %v1065_v31 }
 0x3ac   :  { %v167_v16 = vpop.xlane.xlu0 %166 }
 0x3ad   :  { %v1067_v49 = vmul.f32 -1.0, %v1066_v62  ;;  %v1070_v28 = vadd.f32 %v1069_v1, %v167_v16 }
 0x3af   :  { %v1068_v26 = vmax.f32 %v1067_v49, -73.682724  ;;  %v1073_v4 = vsub.f32 %v1070_v28, %v1072_v38 }
 0x3b1   :  { %v1074_v19 = vadd.f32 %v1073_v4, %v1068_v26 }
 0x3b3   :  { %v1075_v61 = vrot.slane %v1074_v19, 4 }
 0x3b5   :  { %v1076_v6 = vmax.f32 %v1074_v19, %v1075_v61 }
 0x3b7   :  { %v1077_v13 = vrot.slane %v1076_v6, 2 }
 0x3b9   :  { %v1078_v30 = vmax.f32 %v1076_v6, %v1077_v13 }
 0x3bb   :  { %v1079_v48 = vrot.slane %v1078_v30, 1 }
 0x3bd   :  { %v1080_v43 = vmax.f32 %v1078_v30, %v1079_v48 }
 0x3bf   :  { %v1081_v15 = vsub.f32 %v1074_v19, %v1080_v43 }
 0x3c1   :  { %v1082_v53 = vmul.f32 1.442695, %v1081_v15 }
 0x3c3   :  { %1149 = vpow2.f32 %v1082_v53 }
 0x3d0   :  { %v1150_v12 = vpop.eup %1149 }
 0x3d1   :  { %v1084_v56 = vrot.slane %v1150_v12, 4 }
 0x3d3   :  { %v1085_v29 = vadd.f32 %v1150_v12, %v1084_v56 }
 0x3d5   :  { %v1086_v41 = vrot.slane %v1085_v29, 2 }
 0x3d7   :  { %v1087_v40 = vadd.f32 %v1086_v41, %v1085_v29 }
 0x3d9   :  { %v1088_v58 = vrot.slane %v1087_v40, 1 }
 0x3db   :  { %v1089_v5 = vadd.f32 %v1088_v58, %v1087_v40 }
 0x3dd   :  { %1151 = vrcp.f32 %v1089_v5 }
 0x3ea   :  { %v1152_v20 = vpop.eup %1151 }
 0x3eb   :  { %v1091_v24 = vmul.f32 %v1152_v20, %v1150_v12 }
 0x3ed   :  { %v1092_v44 = vmul.f32 %v1153_v7, %v1091_v24  ;;  %v1100_v23 = vmul.f32 %v1154_v2, %v1091_v24 }
 0x3ef   :  { %v1093_v27 = vsel %vm21_vm1, %v1092_v44, 0.0  ;;  %v1101_v3 = vsel %vm21_vm1, %v1100_v23, 0.0 }
 0x3f0   :  { %v1094_v21 = vrot.slane %v1093_v27, 4  ;;  %v1102_v60 = vrot.slane %v1101_v3, 4 }
 0x3f2   :  { %v1095_v32 = vadd.f32 %v1094_v21, %v1093_v27  ;;  %v1103_v42 = vadd.f32 %v1102_v60, %v1101_v3 }
 0x3f4   :  { %v1096_v54 = vrot.slane %v1095_v32, 2  ;;  %v1104_v17 = vrot.slane %v1103_v42, 2 }
 0x3f6   :  { %v1097_v45 = vadd.f32 %v1096_v54, %v1095_v32  ;;  %v1105_v11 = vadd.f32 %v1104_v17, %v1103_v42 }
 0x3f8   :  { %v1098_v39 = vrot.slane %v1097_v45, 1  ;;  %v1106_v57 = vrot.slane %v1105_v11, 1 }
 0x3fa   :  { %v1099_v33 = vadd.f32 %v1098_v39, %v1097_v45  ;;  %v1107_v0 = vadd.f32 %v1106_v57, %v1105_v11 }
 0x3fc   :  { %v1109_v52 = vsel %vm1108_vm0, %v1099_v33, %v1107_v0 }
 0x3fd   :  { %1111 = vst.msk [vmem:[#allocation2] sm:$0x3] %vm1110_vm2, %v1109_v52 }
 0x3fe   :  { %1166 = shalt.err (!%p1163_p4)
}
 0x3ff   :  { %1121 = dma.vmem_to_hbm [thread:$0]  %s1119_s29, 32, %s2235_s4, [#allocation3]  }
 0x400   :  { %1175 = dma.done.wait [#allocation3], 32  }
 0x401   :  { %1176 = vsyncadd [#allocation3], 4294967264 }
 0x402   :  { %1125 = vsyncpa [#allocation3], 1 }

</bundles_post_ra>
